<compile_context>
chip_gen: v6e
topology: v6e:2x2x1
jax: 0.10.0
libtpu: 0.0.40
codegen_flags: <defaults>
</compile_context>

<pallas_src>
import functools

import jax
import jax.numpy as jnp
from jax.experimental import pallas as pl
from jax.experimental.pallas import tpu as pltpu


def _lstm_fc_kernel(x_ref, wih_ref, whh_ref, b_ref,
                    w1_ref, b1_ref, w2_ref, b2_ref,
                    out_ref, *, seq_len, hidden_size, batch_pad):
    T, H, B = seq_len, hidden_size, batch_pad

    # Batched input projection for ALL timesteps at once: (T*B, I) @ (I, 4H).
    # The combined gate bias (b_ih + b_hh) is folded in here once, so no
    # per-step broadcast/add is needed inside the recurrence.
    x_proj = (jnp.dot(x_ref[...], wih_ref[...],
                      preferred_element_type=jnp.float32)
              + b_ref[...])                              # (T*B, 4H)

    whh = whh_ref[...]                                   # (H, 4H), loaded once

    h = jnp.zeros((B, H), jnp.float32)
    c = jnp.zeros((B, H), jnp.float32)

    # Small static T -> fully unrolled at trace time; h/c stay register-carried
    # (each is a handful of vregs), no VMEM scratch round-trips per step.
    for t in range(T):
        gates = x_proj[t * B:(t + 1) * B] + jnp.dot(
            h, whh, preferred_element_type=jnp.float32)  # (B, 4H)
        i_g = jax.nn.sigmoid(gates[:, 0 * H:1 * H])
        f_g = jax.nn.sigmoid(gates[:, 1 * H:2 * H])
        g_g = jnp.tanh(gates[:, 2 * H:3 * H])
        o_g = jax.nn.sigmoid(gates[:, 3 * H:4 * H])
        c = f_g * c + i_g * g_g
        h = o_g * jnp.tanh(c)

    # FC head: Linear(H->128) + ReLU + Dropout(identity, eval) + Linear(128->O_pad)
    fc1 = jnp.maximum(
        jnp.dot(h, w1_ref[...], preferred_element_type=jnp.float32) + b1_ref[...],
        0.0)
    out = jnp.dot(fc1, w2_ref[...], preferred_element_type=jnp.float32) + b2_ref[...]
    out_ref[...] = out.astype(out_ref.dtype)


def lstm_network_forward(x, params):
    """x: (B, T, I) float32 (batch_first). Returns (B, output_size) float32."""
    B, T, I = x.shape
    H = params["w_hh"].shape[1]          # w_hh: (4H, H)
    O = params["w_fc2"].shape[0]         # w_fc2: (O, F)
    F = params["w_fc1"].shape[0]         # F = 128

    # Pad batch to a sublane multiple; pad output dim to a full 128-lane store.
    B_pad = max(8, ((B + 7) // 8) * 8)
    O_pad = max(128, ((O + 127) // 128) * 128)

    x_p = jnp.zeros((B_pad, T, I), x.dtype).at[:B].set(x)
    # (T, B_pad, I) flattened to 2D so the kernel does ONE input-proj matmul.
    x2d = jnp.transpose(x_p, (1, 0, 2)).reshape(T * B_pad, I)

    # Pre-transpose weights so the kernel does plain row-major MXU matmuls.
    wih_t = params["w_ih"].T                              # (I, 4H)
    whh_t = params["w_hh"].T                              # (H, 4H)
    b_gate = (params["b_ih"] + params["b_hh"]).reshape(1, 4 * H)
    w1_t = params["w_fc1"].T                              # (H, F)
    b1 = params["b_fc1"].reshape(1, F)
    w2_t = jnp.zeros((F, O_pad), jnp.float32).at[:, :O].set(params["w_fc2"].T)
    b2 = jnp.zeros((1, O_pad), jnp.float32).at[:, :O].set(
        params["b_fc2"].reshape(1, O))

    kernel = functools.partial(_lstm_fc_kernel, seq_len=T,
                               hidden_size=H, batch_pad=B_pad)

    vmem_spec = pl.BlockSpec(memory_space=pltpu.MemorySpace.VMEM)
    out = pl.pallas_call(
        kernel,
        out_shape=jax.ShapeDtypeStruct((B_pad, O_pad), jnp.float32),
        in_specs=[vmem_spec] * 8,
        out_specs=vmem_spec,
    )(x2d, wih_t, whh_t, b_gate, w1_t, b1, w2_t, b2)

    return out[:B, :O]


def init_params(key, input_size=5, hidden_size=128, output_size=3):
    """Deterministic init mimicking PyTorch uniform(-1/sqrt(H), 1/sqrt(H))."""
    ks = jax.random.split(key, 8)
    H, I, O, F = hidden_size, input_size, output_size, 128
    s = 1.0 / jnp.sqrt(H)
    u = lambda k, shape, sc: jax.random.uniform(k, shape, jnp.float32, -sc, sc)
    return {
        "w_ih": u(ks[0], (4 * H, I), s),
        "w_hh": u(ks[1], (4 * H, H), s),
        "b_ih": u(ks[2], (4 * H,), s),
        "b_hh": u(ks[3], (4 * H,), s),
        "w_fc1": u(ks[4], (F, H), 1.0 / jnp.sqrt(H)),
        "b_fc1": u(ks[5], (F,), 1.0 / jnp.sqrt(H)),
        "w_fc2": u(ks[6], (O, F), 1.0 / jnp.sqrt(F)),
        "b_fc2": u(ks[7], (O,), 1.0 / jnp.sqrt(F)),
    }


def reference_forward(x, p):
    """Pure-JAX reference (lax.scan LSTM + FC head, eval-mode dropout)."""
    B, T, I = x.shape
    H = p["w_hh"].shape[1]

    def step(carry, x_t):
        h, c = carry
        gates = x_t @ p["w_ih"].T + p["b_ih"] + h @ p["w_hh"].T + p["b_hh"]
        i, f, g, o = jnp.split(gates, 4, axis=-1)
        i, f, o = jax.nn.sigmoid(i), jax.nn.sigmoid(f), jax.nn.sigmoid(o)
        g = jnp.tanh(g)
        c = f * c + i * g
        h = o * jnp.tanh(c)
        return (h, c), h

    init = (jnp.zeros((B, H), jnp.float32), jnp.zeros((B, H), jnp.float32))
    (h_last, _), _ = jax.lax.scan(step, init, jnp.transpose(x, (1, 0, 2)))
    fc1 = jnp.maximum(h_last @ p["w_fc1"].T + p["b_fc1"], 0.0)
    return fc1 @ p["w_fc2"].T + p["b_fc2"]


if __name__ == "__main__":
    key = jax.random.PRNGKey(0)
    k_x, k_p = jax.random.split(key)

    B, T, I = 2, 8, 5
    x = jax.random.normal(k_x, (B, T, I), jnp.float32)
    params = init_params(k_p, input_size=I, hidden_size=128, output_size=3)

    out = lstm_network_forward(x, params)
    out = jax.block_until_ready(out)

    ref = reference_forward(x, params)
    assert out.shape == (B, 3)
    assert jnp.allclose(out, ref, atol=1e-4, rtol=1e-4), (out, ref)

    print("KERNEL_OK")
</pallas_src>

<mosaic_0001>
module attributes {stable_mosaic.version = 11 : i64} {
  func.func @_lstm_fc_kernel(%arg0: memref<64x5xf32, #tpu.memory_space<vmem>>, %arg1: memref<5x512xf32, #tpu.memory_space<vmem>>, %arg2: memref<128x512xf32, #tpu.memory_space<vmem>>, %arg3: memref<1x512xf32, #tpu.memory_space<vmem>>, %arg4: memref<128x128xf32, #tpu.memory_space<vmem>>, %arg5: memref<1x128xf32, #tpu.memory_space<vmem>>, %arg6: memref<128x128xf32, #tpu.memory_space<vmem>>, %arg7: memref<1x128xf32, #tpu.memory_space<vmem>>, %arg8: memref<8x128xf32, #tpu.memory_space<vmem>>) attributes {dimension_semantics = [], scalar_prefetch = 0 : i64, scratch_operands = 0 : i64, tpu.core_type = #tpu.core_type<tc>} {
    %c0 = arith.constant 0 : index
    %c0_0 = arith.constant 0 : index
    %0 = vector.load %arg0[%c0, %c0_0] : memref<64x5xf32, #tpu.memory_space<vmem>>, vector<64x5xf32>
    %c0_1 = arith.constant 0 : index
    %c0_2 = arith.constant 0 : index
    %1 = vector.load %arg1[%c0_1, %c0_2] : memref<5x512xf32, #tpu.memory_space<vmem>>, vector<5x512xf32>
    %cst = arith.constant dense<0.000000e+00> : vector<64x512xf32>
    %2 = tpu.matmul %0, %1, %cst {dimension_numbers = #tpu.dot_dimension_numbers<[1], [0], [0], [1], [0, 0, 1, 1], [], []>} : vector<64x5xf32>, vector<5x512xf32>, vector<64x512xf32> -> vector<64x512xf32>
    %c0_3 = arith.constant 0 : index
    %c0_4 = arith.constant 0 : index
    %3 = vector.load %arg3[%c0_3, %c0_4] : memref<1x512xf32, #tpu.memory_space<vmem>>, vector<1x512xf32>
    %4 = vector.broadcast %3 : vector<1x512xf32> to vector<64x512xf32>
    %5 = arith.addf %2, %4 : vector<64x512xf32>
    %c0_5 = arith.constant 0 : index
    %c0_6 = arith.constant 0 : index
    %6 = vector.load %arg2[%c0_5, %c0_6] : memref<128x512xf32, #tpu.memory_space<vmem>>, vector<128x512xf32>
    %cst_7 = arith.constant 0.000000e+00 : f32
    %7 = vector.broadcast %cst_7 : f32 to vector<8x128xf32>
    %cst_8 = arith.constant 0.000000e+00 : f32
    %8 = vector.broadcast %cst_8 : f32 to vector<8x128xf32>
    %9 = vector.extract_strided_slice %5 {offsets = [0, 0], sizes = [8, 512], strides = [1, 1]} : vector<64x512xf32> to vector<8x512xf32>
    %cst_9 = arith.constant dense<0.000000e+00> : vector<8x512xf32>
    %10 = tpu.matmul %7, %6, %cst_9 {dimension_numbers = #tpu.dot_dimension_numbers<[1], [0], [0], [1], [0, 0, 1, 1], [], []>} : vector<8x128xf32>, vector<128x512xf32>, vector<8x512xf32> -> vector<8x512xf32>
    %11 = arith.addf %9, %10 : vector<8x512xf32>
    %12 = vector.extract_strided_slice %11 {offsets = [0, 0], sizes = [8, 128], strides = [1, 1]} : vector<8x512xf32> to vector<8x128xf32>
    %13 = arith.negf %12 : vector<8x128xf32>
    %14 = math.exp %13 : vector<8x128xf32>
    %cst_10 = arith.constant 1.000000e+00 : f32
    %15 = vector.broadcast %cst_10 : f32 to vector<8x128xf32>
    %16 = arith.addf %15, %14 : vector<8x128xf32>
    %17 = arith.divf %15, %16 : vector<8x128xf32>
    %18 = vector.extract_strided_slice %11 {offsets = [0, 128], sizes = [8, 128], strides = [1, 1]} : vector<8x512xf32> to vector<8x128xf32>
    %19 = arith.negf %18 : vector<8x128xf32>
    %20 = math.exp %19 : vector<8x128xf32>
    %cst_11 = arith.constant 1.000000e+00 : f32
    %21 = vector.broadcast %cst_11 : f32 to vector<8x128xf32>
    %22 = arith.addf %21, %20 : vector<8x128xf32>
    %23 = arith.divf %21, %22 : vector<8x128xf32>
    %24 = vector.extract_strided_slice %11 {offsets = [0, 256], sizes = [8, 128], strides = [1, 1]} : vector<8x512xf32> to vector<8x128xf32>
    %25 = math.tanh %24 : vector<8x128xf32>
    %26 = vector.extract_strided_slice %11 {offsets = [0, 384], sizes = [8, 128], strides = [1, 1]} : vector<8x512xf32> to vector<8x128xf32>
    %27 = arith.negf %26 : vector<8x128xf32>
    %28 = math.exp %27 : vector<8x128xf32>
    %cst_12 = arith.constant 1.000000e+00 : f32
    %29 = vector.broadcast %cst_12 : f32 to vector<8x128xf32>
    %30 = arith.addf %29, %28 : vector<8x128xf32>
    %31 = arith.divf %29, %30 : vector<8x128xf32>
    %32 = arith.mulf %23, %8 : vector<8x128xf32>
    %33 = arith.mulf %17, %25 : vector<8x128xf32>
    %34 = arith.addf %32, %33 : vector<8x128xf32>
    %35 = math.tanh %34 : vector<8x128xf32>
    %36 = arith.mulf %31, %35 : vector<8x128xf32>
    %37 = vector.extract_strided_slice %5 {offsets = [8, 0], sizes = [8, 512], strides = [1, 1]} : vector<64x512xf32> to vector<8x512xf32>
    %cst_13 = arith.constant dense<0.000000e+00> : vector<8x512xf32>
    %38 = tpu.matmul %36, %6, %cst_13 {dimension_numbers = #tpu.dot_dimension_numbers<[1], [0], [0], [1], [0, 0, 1, 1], [], []>} : vector<8x128xf32>, vector<128x512xf32>, vector<8x512xf32> -> vector<8x512xf32>
    %39 = arith.addf %37, %38 : vector<8x512xf32>
    %40 = vector.extract_strided_slice %39 {offsets = [0, 0], sizes = [8, 128], strides = [1, 1]} : vector<8x512xf32> to vector<8x128xf32>
    %41 = arith.negf %40 : vector<8x128xf32>
    %42 = math.exp %41 : vector<8x128xf32>
    %cst_14 = arith.constant 1.000000e+00 : f32
    %43 = vector.broadcast %cst_14 : f32 to vector<8x128xf32>
    %44 = arith.addf %43, %42 : vector<8x128xf32>
    %45 = arith.divf %43, %44 : vector<8x128xf32>
    %46 = vector.extract_strided_slice %39 {offsets = [0, 128], sizes = [8, 128], strides = [1, 1]} : vector<8x512xf32> to vector<8x128xf32>
    %47 = arith.negf %46 : vector<8x128xf32>
    %48 = math.exp %47 : vector<8x128xf32>
    %cst_15 = arith.constant 1.000000e+00 : f32
    %49 = vector.broadcast %cst_15 : f32 to vector<8x128xf32>
    %50 = arith.addf %49, %48 : vector<8x128xf32>
    %51 = arith.divf %49, %50 : vector<8x128xf32>
    %52 = vector.extract_strided_slice %39 {offsets = [0, 256], sizes = [8, 128], strides = [1, 1]} : vector<8x512xf32> to vector<8x128xf32>
    %53 = math.tanh %52 : vector<8x128xf32>
    %54 = vector.extract_strided_slice %39 {offsets = [0, 384], sizes = [8, 128], strides = [1, 1]} : vector<8x512xf32> to vector<8x128xf32>
    %55 = arith.negf %54 : vector<8x128xf32>
    %56 = math.exp %55 : vector<8x128xf32>
    %cst_16 = arith.constant 1.000000e+00 : f32
    %57 = vector.broadcast %cst_16 : f32 to vector<8x128xf32>
    %58 = arith.addf %57, %56 : vector<8x128xf32>
    %59 = arith.divf %57, %58 : vector<8x128xf32>
    %60 = arith.mulf %51, %34 : vector<8x128xf32>
    %61 = arith.mulf %45, %53 : vector<8x128xf32>
    %62 = arith.addf %60, %61 : vector<8x128xf32>
    %63 = math.tanh %62 : vector<8x128xf32>
    %64 = arith.mulf %59, %63 : vector<8x128xf32>
    %65 = vector.extract_strided_slice %5 {offsets = [16, 0], sizes = [8, 512], strides = [1, 1]} : vector<64x512xf32> to vector<8x512xf32>
    %cst_17 = arith.constant dense<0.000000e+00> : vector<8x512xf32>
    %66 = tpu.matmul %64, %6, %cst_17 {dimension_numbers = #tpu.dot_dimension_numbers<[1], [0], [0], [1], [0, 0, 1, 1], [], []>} : vector<8x128xf32>, vector<128x512xf32>, vector<8x512xf32> -> vector<8x512xf32>
    %67 = arith.addf %65, %66 : vector<8x512xf32>
    %68 = vector.extract_strided_slice %67 {offsets = [0, 0], sizes = [8, 128], strides = [1, 1]} : vector<8x512xf32> to vector<8x128xf32>
    %69 = arith.negf %68 : vector<8x128xf32>
    %70 = math.exp %69 : vector<8x128xf32>
    %cst_18 = arith.constant 1.000000e+00 : f32
    %71 = vector.broadcast %cst_18 : f32 to vector<8x128xf32>
    %72 = arith.addf %71, %70 : vector<8x128xf32>
    %73 = arith.divf %71, %72 : vector<8x128xf32>
    %74 = vector.extract_strided_slice %67 {offsets = [0, 128], sizes = [8, 128], strides = [1, 1]} : vector<8x512xf32> to vector<8x128xf32>
    %75 = arith.negf %74 : vector<8x128xf32>
    %76 = math.exp %75 : vector<8x128xf32>
    %cst_19 = arith.constant 1.000000e+00 : f32
    %77 = vector.broadcast %cst_19 : f32 to vector<8x128xf32>
    %78 = arith.addf %77, %76 : vector<8x128xf32>
    %79 = arith.divf %77, %78 : vector<8x128xf32>
    %80 = vector.extract_strided_slice %67 {offsets = [0, 256], sizes = [8, 128], strides = [1, 1]} : vector<8x512xf32> to vector<8x128xf32>
    %81 = math.tanh %80 : vector<8x128xf32>
    %82 = vector.extract_strided_slice %67 {offsets = [0, 384], sizes = [8, 128], strides = [1, 1]} : vector<8x512xf32> to vector<8x128xf32>
    %83 = arith.negf %82 : vector<8x128xf32>
    %84 = math.exp %83 : vector<8x128xf32>
    %cst_20 = arith.constant 1.000000e+00 : f32
    %85 = vector.broadcast %cst_20 : f32 to vector<8x128xf32>
    %86 = arith.addf %85, %84 : vector<8x128xf32>
    %87 = arith.divf %85, %86 : vector<8x128xf32>
    %88 = arith.mulf %79, %62 : vector<8x128xf32>
    %89 = arith.mulf %73, %81 : vector<8x128xf32>
    %90 = arith.addf %88, %89 : vector<8x128xf32>
    %91 = math.tanh %90 : vector<8x128xf32>
    %92 = arith.mulf %87, %91 : vector<8x128xf32>
    %93 = vector.extract_strided_slice %5 {offsets = [24, 0], sizes = [8, 512], strides = [1, 1]} : vector<64x512xf32> to vector<8x512xf32>
    %cst_21 = arith.constant dense<0.000000e+00> : vector<8x512xf32>
    %94 = tpu.matmul %92, %6, %cst_21 {dimension_numbers = #tpu.dot_dimension_numbers<[1], [0], [0], [1], [0, 0, 1, 1], [], []>} : vector<8x128xf32>, vector<128x512xf32>, vector<8x512xf32> -> vector<8x512xf32>
    %95 = arith.addf %93, %94 : vector<8x512xf32>
    %96 = vector.extract_strided_slice %95 {offsets = [0, 0], sizes = [8, 128], strides = [1, 1]} : vector<8x512xf32> to vector<8x128xf32>
    %97 = arith.negf %96 : vector<8x128xf32>
    %98 = math.exp %97 : vector<8x128xf32>
    %cst_22 = arith.constant 1.000000e+00 : f32
    %99 = vector.broadcast %cst_22 : f32 to vector<8x128xf32>
    %100 = arith.addf %99, %98 : vector<8x128xf32>
    %101 = arith.divf %99, %100 : vector<8x128xf32>
    %102 = vector.extract_strided_slice %95 {offsets = [0, 128], sizes = [8, 128], strides = [1, 1]} : vector<8x512xf32> to vector<8x128xf32>
    %103 = arith.negf %102 : vector<8x128xf32>
    %104 = math.exp %103 : vector<8x128xf32>
    %cst_23 = arith.constant 1.000000e+00 : f32
    %105 = vector.broadcast %cst_23 : f32 to vector<8x128xf32>
    %106 = arith.addf %105, %104 : vector<8x128xf32>
    %107 = arith.divf %105, %106 : vector<8x128xf32>
    %108 = vector.extract_strided_slice %95 {offsets = [0, 256], sizes = [8, 128], strides = [1, 1]} : vector<8x512xf32> to vector<8x128xf32>
    %109 = math.tanh %108 : vector<8x128xf32>
    %110 = vector.extract_strided_slice %95 {offsets = [0, 384], sizes = [8, 128], strides = [1, 1]} : vector<8x512xf32> to vector<8x128xf32>
    %111 = arith.negf %110 : vector<8x128xf32>
    %112 = math.exp %111 : vector<8x128xf32>
    %cst_24 = arith.constant 1.000000e+00 : f32
    %113 = vector.broadcast %cst_24 : f32 to vector<8x128xf32>
    %114 = arith.addf %113, %112 : vector<8x128xf32>
    %115 = arith.divf %113, %114 : vector<8x128xf32>
    %116 = arith.mulf %107, %90 : vector<8x128xf32>
    %117 = arith.mulf %101, %109 : vector<8x128xf32>
    %118 = arith.addf %116, %117 : vector<8x128xf32>
    %119 = math.tanh %118 : vector<8x128xf32>
    %120 = arith.mulf %115, %119 : vector<8x128xf32>
    %121 = vector.extract_strided_slice %5 {offsets = [32, 0], sizes = [8, 512], strides = [1, 1]} : vector<64x512xf32> to vector<8x512xf32>
    %cst_25 = arith.constant dense<0.000000e+00> : vector<8x512xf32>
    %122 = tpu.matmul %120, %6, %cst_25 {dimension_numbers = #tpu.dot_dimension_numbers<[1], [0], [0], [1], [0, 0, 1, 1], [], []>} : vector<8x128xf32>, vector<128x512xf32>, vector<8x512xf32> -> vector<8x512xf32>
    %123 = arith.addf %121, %122 : vector<8x512xf32>
    %124 = vector.extract_strided_slice %123 {offsets = [0, 0], sizes = [8, 128], strides = [1, 1]} : vector<8x512xf32> to vector<8x128xf32>
    %125 = arith.negf %124 : vector<8x128xf32>
    %126 = math.exp %125 : vector<8x128xf32>
    %cst_26 = arith.constant 1.000000e+00 : f32
    %127 = vector.broadcast %cst_26 : f32 to vector<8x128xf32>
    %128 = arith.addf %127, %126 : vector<8x128xf32>
    %129 = arith.divf %127, %128 : vector<8x128xf32>
    %130 = vector.extract_strided_slice %123 {offsets = [0, 128], sizes = [8, 128], strides = [1, 1]} : vector<8x512xf32> to vector<8x128xf32>
    %131 = arith.negf %130 : vector<8x128xf32>
    %132 = math.exp %131 : vector<8x128xf32>
    %cst_27 = arith.constant 1.000000e+00 : f32
    %133 = vector.broadcast %cst_27 : f32 to vector<8x128xf32>
    %134 = arith.addf %133, %132 : vector<8x128xf32>
    %135 = arith.divf %133, %134 : vector<8x128xf32>
    %136 = vector.extract_strided_slice %123 {offsets = [0, 256], sizes = [8, 128], strides = [1, 1]} : vector<8x512xf32> to vector<8x128xf32>
    %137 = math.tanh %136 : vector<8x128xf32>
    %138 = vector.extract_strided_slice %123 {offsets = [0, 384], sizes = [8, 128], strides = [1, 1]} : vector<8x512xf32> to vector<8x128xf32>
    %139 = arith.negf %138 : vector<8x128xf32>
    %140 = math.exp %139 : vector<8x128xf32>
    %cst_28 = arith.constant 1.000000e+00 : f32
    %141 = vector.broadcast %cst_28 : f32 to vector<8x128xf32>
    %142 = arith.addf %141, %140 : vector<8x128xf32>
    %143 = arith.divf %141, %142 : vector<8x128xf32>
    %144 = arith.mulf %135, %118 : vector<8x128xf32>
    %145 = arith.mulf %129, %137 : vector<8x128xf32>
    %146 = arith.addf %144, %145 : vector<8x128xf32>
    %147 = math.tanh %146 : vector<8x128xf32>
    %148 = arith.mulf %143, %147 : vector<8x128xf32>
    %149 = vector.extract_strided_slice %5 {offsets = [40, 0], sizes = [8, 512], strides = [1, 1]} : vector<64x512xf32> to vector<8x512xf32>
    %cst_29 = arith.constant dense<0.000000e+00> : vector<8x512xf32>
    %150 = tpu.matmul %148, %6, %cst_29 {dimension_numbers = #tpu.dot_dimension_numbers<[1], [0], [0], [1], [0, 0, 1, 1], [], []>} : vector<8x128xf32>, vector<128x512xf32>, vector<8x512xf32> -> vector<8x512xf32>
    %151 = arith.addf %149, %150 : vector<8x512xf32>
    %152 = vector.extract_strided_slice %151 {offsets = [0, 0], sizes = [8, 128], strides = [1, 1]} : vector<8x512xf32> to vector<8x128xf32>
    %153 = arith.negf %152 : vector<8x128xf32>
    %154 = math.exp %153 : vector<8x128xf32>
    %cst_30 = arith.constant 1.000000e+00 : f32
    %155 = vector.broadcast %cst_30 : f32 to vector<8x128xf32>
    %156 = arith.addf %155, %154 : vector<8x128xf32>
    %157 = arith.divf %155, %156 : vector<8x128xf32>
    %158 = vector.extract_strided_slice %151 {offsets = [0, 128], sizes = [8, 128], strides = [1, 1]} : vector<8x512xf32> to vector<8x128xf32>
    %159 = arith.negf %158 : vector<8x128xf32>
    %160 = math.exp %159 : vector<8x128xf32>
    %cst_31 = arith.constant 1.000000e+00 : f32
    %161 = vector.broadcast %cst_31 : f32 to vector<8x128xf32>
    %162 = arith.addf %161, %160 : vector<8x128xf32>
    %163 = arith.divf %161, %162 : vector<8x128xf32>
    %164 = vector.extract_strided_slice %151 {offsets = [0, 256], sizes = [8, 128], strides = [1, 1]} : vector<8x512xf32> to vector<8x128xf32>
    %165 = math.tanh %164 : vector<8x128xf32>
    %166 = vector.extract_strided_slice %151 {offsets = [0, 384], sizes = [8, 128], strides = [1, 1]} : vector<8x512xf32> to vector<8x128xf32>
    %167 = arith.negf %166 : vector<8x128xf32>
    %168 = math.exp %167 : vector<8x128xf32>
    %cst_32 = arith.constant 1.000000e+00 : f32
    %169 = vector.broadcast %cst_32 : f32 to vector<8x128xf32>
    %170 = arith.addf %169, %168 : vector<8x128xf32>
    %171 = arith.divf %169, %170 : vector<8x128xf32>
    %172 = arith.mulf %163, %146 : vector<8x128xf32>
    %173 = arith.mulf %157, %165 : vector<8x128xf32>
    %174 = arith.addf %172, %173 : vector<8x128xf32>
    %175 = math.tanh %174 : vector<8x128xf32>
    %176 = arith.mulf %171, %175 : vector<8x128xf32>
    %177 = vector.extract_strided_slice %5 {offsets = [48, 0], sizes = [8, 512], strides = [1, 1]} : vector<64x512xf32> to vector<8x512xf32>
    %cst_33 = arith.constant dense<0.000000e+00> : vector<8x512xf32>
    %178 = tpu.matmul %176, %6, %cst_33 {dimension_numbers = #tpu.dot_dimension_numbers<[1], [0], [0], [1], [0, 0, 1, 1], [], []>} : vector<8x128xf32>, vector<128x512xf32>, vector<8x512xf32> -> vector<8x512xf32>
    %179 = arith.addf %177, %178 : vector<8x512xf32>
    %180 = vector.extract_strided_slice %179 {offsets = [0, 0], sizes = [8, 128], strides = [1, 1]} : vector<8x512xf32> to vector<8x128xf32>
    %181 = arith.negf %180 : vector<8x128xf32>
    %182 = math.exp %181 : vector<8x128xf32>
    %cst_34 = arith.constant 1.000000e+00 : f32
    %183 = vector.broadcast %cst_34 : f32 to vector<8x128xf32>
    %184 = arith.addf %183, %182 : vector<8x128xf32>
    %185 = arith.divf %183, %184 : vector<8x128xf32>
    %186 = vector.extract_strided_slice %179 {offsets = [0, 128], sizes = [8, 128], strides = [1, 1]} : vector<8x512xf32> to vector<8x128xf32>
    %187 = arith.negf %186 : vector<8x128xf32>
    %188 = math.exp %187 : vector<8x128xf32>
    %cst_35 = arith.constant 1.000000e+00 : f32
    %189 = vector.broadcast %cst_35 : f32 to vector<8x128xf32>
    %190 = arith.addf %189, %188 : vector<8x128xf32>
    %191 = arith.divf %189, %190 : vector<8x128xf32>
    %192 = vector.extract_strided_slice %179 {offsets = [0, 256], sizes = [8, 128], strides = [1, 1]} : vector<8x512xf32> to vector<8x128xf32>
    %193 = math.tanh %192 : vector<8x128xf32>
    %194 = vector.extract_strided_slice %179 {offsets = [0, 384], sizes = [8, 128], strides = [1, 1]} : vector<8x512xf32> to vector<8x128xf32>
    %195 = arith.negf %194 : vector<8x128xf32>
    %196 = math.exp %195 : vector<8x128xf32>
    %cst_36 = arith.constant 1.000000e+00 : f32
    %197 = vector.broadcast %cst_36 : f32 to vector<8x128xf32>
    %198 = arith.addf %197, %196 : vector<8x128xf32>
    %199 = arith.divf %197, %198 : vector<8x128xf32>
    %200 = arith.mulf %191, %174 : vector<8x128xf32>
    %201 = arith.mulf %185, %193 : vector<8x128xf32>
    %202 = arith.addf %200, %201 : vector<8x128xf32>
    %203 = math.tanh %202 : vector<8x128xf32>
    %204 = arith.mulf %199, %203 : vector<8x128xf32>
    %205 = vector.extract_strided_slice %5 {offsets = [56, 0], sizes = [8, 512], strides = [1, 1]} : vector<64x512xf32> to vector<8x512xf32>
    %cst_37 = arith.constant dense<0.000000e+00> : vector<8x512xf32>
    %206 = tpu.matmul %204, %6, %cst_37 {dimension_numbers = #tpu.dot_dimension_numbers<[1], [0], [0], [1], [0, 0, 1, 1], [], []>} : vector<8x128xf32>, vector<128x512xf32>, vector<8x512xf32> -> vector<8x512xf32>
    %207 = arith.addf %205, %206 : vector<8x512xf32>
    %208 = vector.extract_strided_slice %207 {offsets = [0, 0], sizes = [8, 128], strides = [1, 1]} : vector<8x512xf32> to vector<8x128xf32>
    %209 = arith.negf %208 : vector<8x128xf32>
    %210 = math.exp %209 : vector<8x128xf32>
    %cst_38 = arith.constant 1.000000e+00 : f32
    %211 = vector.broadcast %cst_38 : f32 to vector<8x128xf32>
    %212 = arith.addf %211, %210 : vector<8x128xf32>
    %213 = arith.divf %211, %212 : vector<8x128xf32>
    %214 = vector.extract_strided_slice %207 {offsets = [0, 128], sizes = [8, 128], strides = [1, 1]} : vector<8x512xf32> to vector<8x128xf32>
    %215 = arith.negf %214 : vector<8x128xf32>
    %216 = math.exp %215 : vector<8x128xf32>
    %cst_39 = arith.constant 1.000000e+00 : f32
    %217 = vector.broadcast %cst_39 : f32 to vector<8x128xf32>
    %218 = arith.addf %217, %216 : vector<8x128xf32>
    %219 = arith.divf %217, %218 : vector<8x128xf32>
    %220 = vector.extract_strided_slice %207 {offsets = [0, 256], sizes = [8, 128], strides = [1, 1]} : vector<8x512xf32> to vector<8x128xf32>
    %221 = math.tanh %220 : vector<8x128xf32>
    %222 = vector.extract_strided_slice %207 {offsets = [0, 384], sizes = [8, 128], strides = [1, 1]} : vector<8x512xf32> to vector<8x128xf32>
    %223 = arith.negf %222 : vector<8x128xf32>
    %224 = math.exp %223 : vector<8x128xf32>
    %cst_40 = arith.constant 1.000000e+00 : f32
    %225 = vector.broadcast %cst_40 : f32 to vector<8x128xf32>
    %226 = arith.addf %225, %224 : vector<8x128xf32>
    %227 = arith.divf %225, %226 : vector<8x128xf32>
    %228 = arith.mulf %219, %202 : vector<8x128xf32>
    %229 = arith.mulf %213, %221 : vector<8x128xf32>
    %230 = arith.addf %228, %229 : vector<8x128xf32>
    %231 = math.tanh %230 : vector<8x128xf32>
    %232 = arith.mulf %227, %231 : vector<8x128xf32>
    %c0_41 = arith.constant 0 : index
    %c0_42 = arith.constant 0 : index
    %233 = vector.load %arg4[%c0_41, %c0_42] : memref<128x128xf32, #tpu.memory_space<vmem>>, vector<128x128xf32>
    %cst_43 = arith.constant dense<0.000000e+00> : vector<8x128xf32>
    %234 = tpu.matmul %232, %233, %cst_43 {dimension_numbers = #tpu.dot_dimension_numbers<[1], [0], [0], [1], [0, 0, 1, 1], [], []>} : vector<8x128xf32>, vector<128x128xf32>, vector<8x128xf32> -> vector<8x128xf32>
    %c0_44 = arith.constant 0 : index
    %c0_45 = arith.constant 0 : index
    %235 = vector.load %arg5[%c0_44, %c0_45] : memref<1x128xf32, #tpu.memory_space<vmem>>, vector<1x128xf32>
    %236 = vector.broadcast %235 : vector<1x128xf32> to vector<8x128xf32>
    %237 = arith.addf %234, %236 : vector<8x128xf32>
    %cst_46 = arith.constant 0.000000e+00 : f32
    %238 = vector.broadcast %cst_46 : f32 to vector<8x128xf32>
    %239 = arith.maximumf %237, %238 : vector<8x128xf32>
    %c0_47 = arith.constant 0 : index
    %c0_48 = arith.constant 0 : index
    %240 = vector.load %arg6[%c0_47, %c0_48] : memref<128x128xf32, #tpu.memory_space<vmem>>, vector<128x128xf32>
    %cst_49 = arith.constant dense<0.000000e+00> : vector<8x128xf32>
    %241 = tpu.matmul %239, %240, %cst_49 {dimension_numbers = #tpu.dot_dimension_numbers<[1], [0], [0], [1], [0, 0, 1, 1], [], []>} : vector<8x128xf32>, vector<128x128xf32>, vector<8x128xf32> -> vector<8x128xf32>
    %c0_50 = arith.constant 0 : index
    %c0_51 = arith.constant 0 : index
    %242 = vector.load %arg7[%c0_50, %c0_51] : memref<1x128xf32, #tpu.memory_space<vmem>>, vector<1x128xf32>
    %243 = vector.broadcast %242 : vector<1x128xf32> to vector<8x128xf32>
    %244 = arith.addf %241, %243 : vector<8x128xf32>
    %c0_52 = arith.constant 0 : index
    %c0_53 = arith.constant 0 : index
    %245 = vector.load %arg8[%c0_52, %c0_53] : memref<8x128xf32, #tpu.memory_space<vmem>>, vector<8x128xf32>
    tpu.vector_store %arg8[%c0_52, %c0_53], %244 {strides = array<i32>} : memref<8x128xf32, #tpu.memory_space<vmem>>, vector<8x128xf32>,
    return
  }
}

</mosaic_0001>

<bundles_post_ra>
// kernel: tpu_custom_call.1
= control target key start
LH: loop header
LB: loop body
LE: loop exit
PB: predicated region body
PF: predicated region fallthrough
CT: control target
= control target key end

     0   :  { %13 = vsyncpa [#allocation3], 0  ;;  %s3543_s0 = inlined_call_operand.vmem [shape: f32[64,5], index: 0, kind: input, shape index: {}]   ;;  %s3544_s1 = inlined_call_operand.vmem [shape: f32[5,512], index: 1, kind: input, shape index: {}]   ;;  %s3545_s2 = inlined_call_operand.hbm [shape: f32[128,512], index: 2, kind: input, shape index: {}]   ;;  %s3546_s3 = inlined_call_operand.vmem [shape: f32[1,512], index: 3, kind: input, shape index: {}]   ;;  %s3547_s4 = inlined_call_operand.hbm [shape: f32[128,128], index: 4, kind: input, shape index: {}]   ;;  %s3548_s5 = inlined_call_operand.vmem [shape: f32[1,128], index: 5, kind: input, shape index: {}]   ;;  %s3549_s6 = inlined_call_operand.hbm [shape: f32[128,128], index: 6, kind: input, shape index: {}]   ;;  %s3550_s7 = inlined_call_operand.vmem [shape: f32[1,128], index: 7, kind: input, shape index: {}]   ;;  %s3551_s8 = inlined_call_operand.hbm [shape: f32[8,128], index: 8, kind: output, shape index: {}]  }
   0x1   :  { %14 = vsyncpa [#allocation6], 0 }
   0x2   :  { %15 = vsyncpa [#allocation4], 0  ;;  %s2435_s27 = smov [#allocation5]  }
   0x3   :  { %s39_s28 = sshll.u32 %s2435_s27, 4  ;;  %s40_s28 = int_to_ptr.vmem [resolvable:$true] %s39_s28 }
   0x4   :  { %s2357_s29 = scalar_lea.vmem %s40_s28, 2048  ;;  %p2362_p1 = scmp.lt.s32.totalorder %s40_s28, %s40_s28 }
   0x5   :  { %p2358_p0 = scmp.ne.s32.totalorder %s40_s28, %s2357_s29  ;;  %p2363_p2 = scmp.lt.s32.totalorder %s2357_s29, %s2357_s29 }
   0x7   :  { %p2364_p3 = por %p2363_p2, %p2362_p1 }
   0x9   :  { %p2365_p4 = pnand %p2364_p3, %p2358_p0 }
   0xb   :  { %2368 = shalt.err (!%p2365_p4)
}
   0xc   :  { %s2436_s30 = smov 128   ;;  %s2437_s9 = smov 8  }
   0xd   :  { %45 = dma.hbm_to_vmem [thread:$0]  %s3547_s4, 2048, %s40_s28, [#allocation6], %s2436_s30, %s2436_s30, %s2437_s9  }
   0xe   :  { %s2438_s12 = smov [#allocation2]  }
   0xf   :  { %s25_s13 = sshll.u32 %s2438_s12, 4  ;;  %s26_s13 = int_to_ptr.vmem [resolvable:$true] %s25_s13 }
  0x10   :  { %s2377_s14 = scalar_lea.vmem %s26_s13, 8192  ;;  %p2382_p6 = scmp.lt.s32.totalorder %s26_s13, %s26_s13 }
  0x11   :  { %p2378_p5 = scmp.ne.s32.totalorder %s26_s13, %s2377_s14  ;;  %p2383_p7 = scmp.lt.s32.totalorder %s2377_s14, %s2377_s14 }
  0x13   :  { %p2384_p8 = por %p2383_p7, %p2382_p6 }
  0x15   :  { %p2385_p9 = pnand %p2384_p8, %p2378_p5 }
  0x17   :  { %2388 = shalt.err (!%p2385_p9)
}
  0x18   :  { %s2439_s15 = smov 512   ;;  %s2440_s16 = smov 32  }
  0x19   :  { %31 = dma.hbm_to_vmem [thread:$0]  %s3545_s2, 8192, %s26_s13, [#allocation3], %s2439_s15, %s2439_s15, %s2440_s16  }
  0x1a   :  { %s2441_s19 = smov [#allocation7]  }
  0x1b   :  { %s53_s20 = sshll.u32 %s2441_s19, 4  ;;  %s54_s20 = int_to_ptr.vmem [resolvable:$true] %s53_s20 }
  0x1c   :  { %s2397_s4 = scalar_lea.vmem %s54_s20, 2048  ;;  %p2402_p11 = scmp.lt.s32.totalorder %s54_s20, %s54_s20 }
  0x1d   :  { %p2398_p10 = scmp.ne.s32.totalorder %s54_s20, %s2397_s4  ;;  %p2403_p12 = scmp.lt.s32.totalorder %s2397_s4, %s2397_s4 }
  0x1f   :  { %p2404_p13 = por %p2403_p12, %p2402_p11 }
  0x21   :  { %p2405_p0 = pnand %p2404_p13, %p2398_p10 }
  0x23   :  { %2408 = shalt.err (!%p2405_p0)
}
  0x24   :  { %59 = dma.hbm_to_vmem [thread:$0]  %s3549_s6, 2048, %s54_s20, [#allocation6], %s2436_s30, %s2436_s30, %s2437_s9  }
  0x25   :  { %2429 = dma.done.wait [#allocation3], 8192  }
  0x26   :  { %2430 = vsyncadd [#allocation3], 4294959104 }
  0x27   :  { %2431 = dma.done.wait [#allocation6], 4096  }
  0x28   :  { %2432 = vsyncadd [#allocation6], 4294963200  ;;  %v3552_v0 = vmov 0.0   ;;  %vm130_vm0 = vcmask 1044480   ;;  %vm105_vm1 = vcmask 39936   ;;  %v71_v5 = vld [vmem:[%s3543_s0] sm:$0xff] }
  0x29   :  { %207 = vmatprep.mubr.f32.mxu0 %v3552_v0  ;;  %320 = vmatprep.mubr.f32.mxu1 %v3552_v0  ;;  %v80_v1 = vld [vmem:[%s3544_s1 + $0x8] sm:$0x1f]  ;;  %v82_v2 = vld [vmem:[%s3544_s1 + $0x18] sm:$0x1f]  ;;  %v79_v3 = vld [vmem:[%s3544_s1] sm:$0x1f] }
  0x2a   :  { %1997 = vmatprep.subr.msk.mxu0 %vm130_vm0, %v80_v1  ;;  %2007 = vmatprep.subr.msk.mxu1 %vm130_vm0, %v82_v2  ;;  %v81_v4 = vld [vmem:[%s3544_s1 + $0x10] sm:$0x1f]  ;;  %v2516_v6 = vld [vmem:[#allocation2 + $0x1e8] sm:$0xff]  ;;  %v2518_v7 = vld [vmem:[#allocation2 + $0x1f8] sm:$0xff]  ;;  %vm2443_vm2 = vmmov 0   ;;  %s2444_s24 = smov [#allocation8]  }
  0x2b   :  { %3640 = vst [vmem:[#allocation12_spill] sm:$0xff] %v2516_v6  ;;  %1998 = vmatpush1.msk.msra.mxu0 %vm130_vm0, %v79_v3  ;;  %2008 = vmatpush1.msk.msra.mxu1 %vm130_vm0, %v81_v4  ;;  %3641 = vst [vmem:[#allocation13_spill] sm:$0xff] %v2518_v7  ;;  %v2520_v8 = vld [vmem:[#allocation2 + $0x1e0] sm:$0xff]  ;;  %v2522_v9 = vld [vmem:[#allocation2 + $0x1f0] sm:$0xff]  ;;  %s1987_s25 = sshll.u32 %s2444_s24, 4  ;;  %s1988_s25 = int_to_ptr.vmem [resolvable:$true] %s1987_s25 }
  0x2c   :  { %1999 = vmatmul.mubr.msk.f32.vlgmr.msra.gmra.mxu0 %vm105_vm1, %v71_v5  ;;  %2009 = vmatmul.mubr.msk.f32.vlgmr.msra.gmra.mxu1 %vm105_vm1, %v71_v5  ;;  %v2526_v10 = vld [vmem:[#allocation2 + $0x1c8] sm:$0xff]  ;;  %v2528_v11 = vld [vmem:[#allocation2 + $0x1d8] sm:$0xff]  ;;  %v2534_v12 = vld [vmem:[#allocation2 + $0x1c0] sm:$0xff]  ;;  %s2409_s6 = scalar_lea.vmem %s1988_s25, 128  ;;  %p2414_p2 = scmp.lt.s32.totalorder %s1988_s25, %s1988_s25 }
  0x2d   :  { %433 = vmatprep.subr.mxu0 %v2516_v6  ;;  %504 = vmatprep.subr.mxu1 %v2518_v7  ;;  %v2536_v13 = vld [vmem:[#allocation2 + $0x1d0] sm:$0xff]  ;;  %v72_v14 = vld [vmem:[%s3543_s0 + $0x8] sm:$0xff]  ;;  %v2547_v16 = vld [vmem:[#allocation2 + $0x1b8] sm:$0xff]  ;;  %p2410_p1 = scmp.ne.s32.totalorder %s1988_s25, %s2409_s6  ;;  %p2415_p3 = scmp.lt.s32.totalorder %s2409_s6, %s2409_s6 }
  0x2e   :  { %434 = vmatpush1.msra.mxu0 %v2520_v8  ;;  %505 = vmatpush1.msra.mxu1 %v2522_v9  ;;  %v2545_v15 = vld [vmem:[#allocation2 + $0x1a8] sm:$0xff]  ;;  %v2551_v17 = vld [vmem:[#allocation2 + $0x1a0] sm:$0xff]  ;;  %v2553_v18 = vld [vmem:[#allocation2 + $0x1b0] sm:$0xff] }
  0x2f   :  { %435 = vmatprep.subr.mxu0 %v2526_v10  ;;  %506 = vmatprep.subr.mxu1 %v2528_v11  ;;  %v2557_v19 = vld [vmem:[#allocation2 + $0x188] sm:$0xff]  ;;  %v2559_v20 = vld [vmem:[#allocation2 + $0x198] sm:$0xff]  ;;  %v2565_v21 = vld [vmem:[#allocation2 + $0x180] sm:$0xff]  ;;  %p2416_p4 = por %p2415_p3, %p2414_p2 }
  0x30   :  { %213 = vmatprep.mubr.f32.mxu0 %v3552_v0  ;;  %326 = vmatprep.mubr.f32.mxu1 %v3552_v0  ;;  %v2567_v22 = vld [vmem:[#allocation2 + $0x190] sm:$0xff]  ;;  %v2576_v24 = vld [vmem:[#allocation2 + $0x168] sm:$0xff]  ;;  %v2578_v25 = vld [vmem:[#allocation2 + $0x178] sm:$0xff] }
  0x31   :  { %436 = vmatpush1.msra.mxu0 %v2534_v12  ;;  %507 = vmatpush1.msra.mxu1 %v2536_v13  ;;  %v73_v23 = vld [vmem:[%s3543_s0 + $0x10] sm:$0xff]  ;;  %v2582_v26 = vld [vmem:[#allocation2 + $0x160] sm:$0xff]  ;;  %v2588_v28 = vld [vmem:[#allocation2 + $0x148] sm:$0xff]  ;;  %p2417_p5 = pnand %p2416_p4, %p2410_p1 }
  0x32   :  { %2000 = vmatmul.mubr.msk.f32.gmra.mxu0 %vm105_vm1, %v72_v14  ;;  %2010 = vmatmul.mubr.msk.f32.gmra.mxu1 %vm105_vm1, %v72_v14  ;;  %v2584_v27 = vld [vmem:[#allocation2 + $0x170] sm:$0xff]  ;;  %v2590_v29 = vld [vmem:[#allocation2 + $0x158] sm:$0xff]  ;;  %v2596_v30 = vld [vmem:[#allocation2 + $0x140] sm:$0xff] }
  0x33   :  { %437 = vmatprep.subr.mxu0 %v2545_v15  ;;  %508 = vmatprep.subr.mxu1 %v2547_v16  ;;  %v2598_v31 = vld [vmem:[#allocation2 + $0x150] sm:$0xff]  ;;  %v74_v32 = vld [vmem:[%s3543_s0 + $0x18] sm:$0xff]  ;;  %v2607_v33 = vld [vmem:[#allocation2 + $0x128] sm:$0xff] }
  0x34   :  { %438 = vmatpush1.msra.mxu0 %v2551_v17  ;;  %509 = vmatpush1.msra.mxu1 %v2553_v18  ;;  %v2609_v34 = vld [vmem:[#allocation2 + $0x138] sm:$0xff]  ;;  %v2613_v35 = vld [vmem:[#allocation2 + $0x120] sm:$0xff]  ;;  %v2615_v36 = vld [vmem:[#allocation2 + $0x130] sm:$0xff] }
  0x35   :  { %439 = vmatprep.subr.mxu0 %v2557_v19  ;;  %510 = vmatprep.subr.mxu1 %v2559_v20  ;;  %v2619_v37 = vld [vmem:[#allocation2 + $0x108] sm:$0xff]  ;;  %v2621_v38 = vld [vmem:[#allocation2 + $0x118] sm:$0xff]  ;;  %v2627_v39 = vld [vmem:[#allocation2 + $0x100] sm:$0xff] }
  0x36   :  { %219 = vmatprep.mubr.f32.mxu0 %v3552_v0  ;;  %332 = vmatprep.mubr.f32.mxu1 %v3552_v0  ;;  %v2629_v40 = vld [vmem:[#allocation2 + $0x110] sm:$0xff]  ;;  %v75_v41 = vld [vmem:[%s3543_s0 + $0x20] sm:$0xff]  ;;  %v2638_v42 = vld [vmem:[#allocation2 + $0xe8] sm:$0xff] }
  0x37   :  { %440 = vmatpush1.msra.mxu0 %v2565_v21  ;;  %511 = vmatpush1.msra.mxu1 %v2567_v22  ;;  %v2640_v43 = vld [vmem:[#allocation2 + $0xf8] sm:$0xff]  ;;  %v2644_v44 = vld [vmem:[#allocation2 + $0xe0] sm:$0xff]  ;;  %v2646_v45 = vld [vmem:[#allocation2 + $0xf0] sm:$0xff] }
  0x38   :  { %2001 = vmatmul.mubr.msk.f32.gmra.mxu0 %vm105_vm1, %v73_v23  ;;  %2011 = vmatmul.mubr.msk.f32.gmra.mxu1 %vm105_vm1, %v73_v23  ;;  %v2650_v46 = vld [vmem:[#allocation2 + $0xc8] sm:$0xff]  ;;  %v2652_v47 = vld [vmem:[#allocation2 + $0xd8] sm:$0xff]  ;;  %v2658_v48 = vld [vmem:[#allocation2 + $0xc0] sm:$0xff] }
  0x39   :  { %441 = vmatprep.subr.mxu0 %v2576_v24  ;;  %512 = vmatprep.subr.mxu1 %v2578_v25  ;;  %v2660_v49 = vld [vmem:[#allocation2 + $0xd0] sm:$0xff]  ;;  %v76_v50 = vld [vmem:[%s3543_s0 + $0x28] sm:$0xff]  ;;  %v2671_v52 = vld [vmem:[#allocation2 + $0xb8] sm:$0xff] }
  0x3a   :  { %442 = vmatpush1.msra.mxu0 %v2582_v26  ;;  %513 = vmatpush1.msra.mxu1 %v2584_v27  ;;  %v2669_v51 = vld [vmem:[#allocation2 + $0xa8] sm:$0xff]  ;;  %v2675_v53 = vld [vmem:[#allocation2 + $0xa0] sm:$0xff]  ;;  %v2677_v54 = vld [vmem:[#allocation2 + $0xb0] sm:$0xff] }
  0x3b   :  { %443 = vmatprep.subr.mxu0 %v2588_v28  ;;  %514 = vmatprep.subr.mxu1 %v2590_v29  ;;  %v2681_v55 = vld [vmem:[#allocation2 + $0x88] sm:$0xff]  ;;  %v2683_v56 = vld [vmem:[#allocation2 + $0x98] sm:$0xff]  ;;  %v2689_v57 = vld [vmem:[#allocation2 + $0x80] sm:$0xff] }
  0x3c   :  { %225 = vmatprep.mubr.f32.mxu0 %v3552_v0  ;;  %338 = vmatprep.mubr.f32.mxu1 %v3552_v0  ;;  %3642 = vst [vmem:[#allocation14_spill] sm:$0xff] %v2681_v55  ;;  %3643 = vst [vmem:[#allocation15_spill] sm:$0xff] %v2683_v56  ;;  %v2691_v58 = vld [vmem:[#allocation2 + $0x90] sm:$0xff]  ;;  %v2700_v60 = vld [vmem:[#allocation2 + $0x68] sm:$0xff] }
  0x3d   :  { %444 = vmatpush1.msra.mxu0 %v2596_v30  ;;  %515 = vmatpush1.msra.mxu1 %v2598_v31  ;;  %3644 = vst [vmem:[#allocation16_spill] sm:$0xff] %v2689_v57  ;;  %3645 = vst [vmem:[#allocation17_spill] sm:$0xff] %v2691_v58  ;;  %v77_v59 = vld [vmem:[%s3543_s0 + $0x30] sm:$0xff]  ;;  %v2702_v61 = vld [vmem:[#allocation2 + $0x78] sm:$0xff] }
  0x3e   :  { %2002 = vmatmul.mubr.msk.f32.gmra.mxu0 %vm105_vm1, %v74_v32  ;;  %2012 = vmatmul.mubr.msk.f32.gmra.mxu1 %vm105_vm1, %v74_v32  ;;  %3646 = vst [vmem:[#allocation18_spill] sm:$0xff] %v2700_v60  ;;  %3647 = vst [vmem:[#allocation19_spill] sm:$0xff] %v2702_v61  ;;  %v2706_v62 = vld [vmem:[#allocation2 + $0x60] sm:$0xff]  ;;  %v2708_v63 = vld [vmem:[#allocation2 + $0x70] sm:$0xff] }
  0x3f   :  { %445 = vmatprep.subr.mxu0 %v2607_v33  ;;  %516 = vmatprep.subr.mxu1 %v2609_v34  ;;  %3648 = vst [vmem:[#allocation20_spill] sm:$0xff] %v2706_v62  ;;  %3649 = vst [vmem:[#allocation21_spill] sm:$0xff] %v2708_v63  ;;  %v2712_v1 = vld [vmem:[#allocation2 + $0x48] sm:$0xff]  ;;  %v2714_v2 = vld [vmem:[#allocation2 + $0x58] sm:$0xff] }
  0x40   :  { %446 = vmatpush1.msra.mxu0 %v2613_v35  ;;  %517 = vmatpush1.msra.mxu1 %v2615_v36  ;;  %3650 = vst [vmem:[#allocation22_spill] sm:$0xff] %v2712_v1  ;;  %3651 = vst [vmem:[#allocation23_spill] sm:$0xff] %v2714_v2  ;;  %v2720_v3 = vld [vmem:[#allocation2 + $0x40] sm:$0xff]  ;;  %v2722_v4 = vld [vmem:[#allocation2 + $0x50] sm:$0xff] }
  0x41   :  { %447 = vmatprep.subr.mxu0 %v2619_v37  ;;  %518 = vmatprep.subr.mxu1 %v2621_v38  ;;  %3652 = vst [vmem:[#allocation24_spill] sm:$0xff] %v2720_v3  ;;  %3653 = vst [vmem:[#allocation25_spill] sm:$0xff] %v2722_v4  ;;  %v78_v5 = vld [vmem:[%s3543_s0 + $0x38] sm:$0xff]  ;;  %v2731_v14 = vld [vmem:[#allocation2 + $0x28] sm:$0xff] }
  0x42   :  { %231 = vmatprep.mubr.f32.mxu0 %v3552_v0  ;;  %344 = vmatprep.mubr.f32.mxu1 %v3552_v0  ;;  %3654 = vst [vmem:[#allocation26_spill] sm:$0xff] %v2731_v14  ;;  %v2733_v23 = vld [vmem:[#allocation2 + $0x38] sm:$0xff]  ;;  %v2737_v32 = vld [vmem:[#allocation2 + $0x20] sm:$0xff] }
  0x43   :  { %448 = vmatpush1.msra.mxu0 %v2627_v39  ;;  %519 = vmatpush1.msra.mxu1 %v2629_v40  ;;  %3655 = vst [vmem:[#allocation27_spill] sm:$0xff] %v2733_v23  ;;  %3656 = vst [vmem:[#allocation28_spill] sm:$0xff] %v2737_v32 }
  0x44   :  { %2003 = vmatmul.mubr.msk.f32.gmra.mxu0 %vm105_vm1, %v75_v41  ;;  %2013 = vmatmul.mubr.msk.f32.gmra.mxu1 %vm105_vm1, %v75_v41  ;;  %v2739_v41 = vld [vmem:[#allocation2 + $0x30] sm:$0xff] }
  0x45   :  { %449 = vmatprep.subr.mxu0 %v2638_v42  ;;  %520 = vmatprep.subr.mxu1 %v2640_v43  ;;  %3657 = vst [vmem:[#allocation29_spill] sm:$0xff] %v2739_v41 }
  0x46   :  { %450 = vmatpush1.msra.mxu0 %v2644_v44  ;;  %521 = vmatpush1.msra.mxu1 %v2646_v45 }
  0x47   :  { %451 = vmatprep.subr.mxu0 %v2650_v46  ;;  %522 = vmatprep.subr.mxu1 %v2652_v47 }
  0x48   :  { %237 = vmatprep.mubr.f32.mxu0 %v3552_v0  ;;  %350 = vmatprep.mubr.f32.mxu1 %v3552_v0 }
  0x49   :  { %452 = vmatpush1.msra.mxu0 %v2658_v48  ;;  %523 = vmatpush1.msra.mxu1 %v2660_v49 }
  0x4a   :  { %2004 = vmatmul.mubr.msk.f32.gmra.mxu0 %vm105_vm1, %v76_v50  ;;  %2014 = vmatmul.mubr.msk.f32.gmra.mxu1 %vm105_vm1, %v76_v50  ;;  %v2743_v50 = vld [vmem:[#allocation2 + $0x8] sm:$0xff] }
  0x4b   :  { %453 = vmatprep.subr.mxu0 %v2669_v51  ;;  %524 = vmatprep.subr.mxu1 %v2671_v52  ;;  %3658 = vst [vmem:[#allocation30_spill] sm:$0xff] %v2743_v50 }
  0x4c   :  { %454 = vmatpush1.msra.mxu0 %v2675_v53  ;;  %525 = vmatpush1.msra.mxu1 %v2677_v54 }
  0x4d   :  { %455 = vmatprep.subr.mxu0 %v2681_v55  ;;  %526 = vmatprep.subr.mxu1 %v2683_v56 }
  0x4e   :  { %243 = vmatprep.mubr.f32.mxu0 %v3552_v0  ;;  %356 = vmatprep.mubr.f32.mxu1 %v3552_v0 }
  0x4f   :  { %456 = vmatpush1.msra.mxu0 %v2689_v57  ;;  %527 = vmatpush1.msra.mxu1 %v2691_v58 }
  0x50   :  { %2005 = vmatmul.mubr.msk.f32.gmra.mxu0 %vm105_vm1, %v77_v59  ;;  %2015 = vmatmul.mubr.msk.f32.gmra.mxu1 %vm105_vm1, %v77_v59  ;;  %v2745_v59 = vld [vmem:[#allocation2 + $0x18] sm:$0xff] }
  0x51   :  { %457 = vmatprep.subr.mxu0 %v2700_v60  ;;  %528 = vmatprep.subr.mxu1 %v2702_v61  ;;  %3659 = vst [vmem:[#allocation31_spill] sm:$0xff] %v2745_v59 }
  0x52   :  { %458 = vmatpush1.msra.mxu0 %v2706_v62  ;;  %529 = vmatpush1.msra.mxu1 %v2708_v63 }
  0x53   :  { %459 = vmatprep.subr.mxu0 %v2712_v1  ;;  %530 = vmatprep.subr.mxu1 %v2714_v2 }
  0x54   :  { %249 = vmatprep.mubr.f32.mxu0 %v3552_v0  ;;  %362 = vmatprep.mubr.f32.mxu1 %v3552_v0  ;;  %v2749_v0 = vld [vmem:[#allocation2] sm:$0xff] }
  0x55   :  { %460 = vmatpush1.msra.mxu0 %v2720_v3  ;;  %531 = vmatpush1.msra.mxu1 %v2722_v4  ;;  %3660 = vst [vmem:[#allocation32_spill] sm:$0xff] %v2749_v0  ;;  %v2753_v4 = vld [vmem:[#allocation2 + $0x10] sm:$0xff] }
  0x56   :  { %2006 = vmatmul.mubr.msk.f32.gmra.mxu0 %vm105_vm1, %v78_v5  ;;  %2016 = vmatmul.mubr.msk.f32.gmra.mxu1 %vm105_vm1, %v78_v5  ;;  %3661 = vst [vmem:[#allocation33_spill] sm:$0xff] %v2753_v4  ;;  %v3662_v5 = vmov 0.0  }
  0x57   :  { %461 = vmatprep.subr.mxu0 %v2731_v14  ;;  %532 = vmatprep.subr.mxu1 %v2733_v23 }
  0x58   :  { %462 = vmatpush1.msra.mxu0 %v2737_v32  ;;  %533 = vmatpush1.msra.mxu1 %v2739_v41 }
  0x59   :  { %463 = vmatprep.subr.mxu0 %v2743_v50  ;;  %534 = vmatprep.subr.mxu1 %v2745_v59 }
  0x5a   :  { %464 = vmatpush1.msra.mxu0 %v2749_v0  ;;  %497 = vmatprep.mubr.f32.mxu0 %v3662_v5 }
  0x5b   :  { %535 = vmatpush1.msra.mxu1 %v2753_v4  ;;  %568 = vmatprep.mubr.f32.mxu1 %v3662_v5 }
  0x5c   :  { %498 = vmatmul.mubr.f32.vlgmr.msra.gmra.mxu0 %v3662_v5  ;;  %569 = vmatmul.mubr.f32.vlgmr.msra.gmra.mxu1 %v3662_v5 }
  0x5d   :  { %603 = vmatprep.subr.mxu0 %v2516_v6  ;;  %674 = vmatprep.subr.mxu1 %v2518_v7 }
  0x5e   :  { %604 = vmatpush1.msra.mxu0 %v2520_v8  ;;  %675 = vmatpush1.msra.mxu1 %v2522_v9 }
  0x5f   :  { %605 = vmatprep.subr.mxu0 %v2526_v10  ;;  %676 = vmatprep.subr.mxu1 %v2528_v11 }
  0x60   :  { %606 = vmatpush1.msra.mxu0 %v2534_v12  ;;  %677 = vmatpush1.msra.mxu1 %v2536_v13 }
  0x61   :  { %607 = vmatprep.subr.mxu0 %v2545_v15  ;;  %678 = vmatprep.subr.mxu1 %v2547_v16 }
  0x62   :  { %608 = vmatpush1.msra.mxu0 %v2551_v17  ;;  %679 = vmatpush1.msra.mxu1 %v2553_v18 }
  0x63   :  { %609 = vmatprep.subr.mxu0 %v2557_v19  ;;  %680 = vmatprep.subr.mxu1 %v2559_v20 }
  0x64   :  { %610 = vmatpush1.msra.mxu0 %v2565_v21  ;;  %681 = vmatpush1.msra.mxu1 %v2567_v22 }
  0x65   :  { %611 = vmatprep.subr.mxu0 %v2576_v24  ;;  %682 = vmatprep.subr.mxu1 %v2578_v25 }
  0x66   :  { %612 = vmatpush1.msra.mxu0 %v2582_v26  ;;  %683 = vmatpush1.msra.mxu1 %v2584_v27 }
  0x67   :  { %613 = vmatprep.subr.mxu0 %v2588_v28  ;;  %684 = vmatprep.subr.mxu1 %v2590_v29 }
  0x68   :  { %614 = vmatpush1.msra.mxu0 %v2596_v30  ;;  %685 = vmatpush1.msra.mxu1 %v2598_v31 }
  0x69   :  { %615 = vmatprep.subr.mxu0 %v2607_v33  ;;  %686 = vmatprep.subr.mxu1 %v2609_v34 }
  0x6a   :  { %616 = vmatpush1.msra.mxu0 %v2613_v35  ;;  %687 = vmatpush1.msra.mxu1 %v2615_v36 }
  0x6b   :  { %617 = vmatprep.subr.mxu0 %v2619_v37  ;;  %688 = vmatprep.subr.mxu1 %v2621_v38 }
  0x6c   :  { %618 = vmatpush1.msra.mxu0 %v2627_v39  ;;  %689 = vmatpush1.msra.mxu1 %v2629_v40 }
  0x6d   :  { %619 = vmatprep.subr.mxu0 %v2638_v42  ;;  %690 = vmatprep.subr.mxu1 %v2640_v43 }
  0x6e   :  { %620 = vmatpush1.msra.mxu0 %v2644_v44  ;;  %691 = vmatpush1.msra.mxu1 %v2646_v45 }
  0x6f   :  { %621 = vmatprep.subr.mxu0 %v2650_v46  ;;  %692 = vmatprep.subr.mxu1 %v2652_v47 }
  0x70   :  { %622 = vmatpush1.msra.mxu0 %v2658_v48  ;;  %693 = vmatpush1.msra.mxu1 %v2660_v49 }
  0x71   :  { %623 = vmatprep.subr.mxu0 %v2669_v51  ;;  %694 = vmatprep.subr.mxu1 %v2671_v52 }
  0x72   :  { %624 = vmatpush1.msra.mxu0 %v2675_v53  ;;  %695 = vmatpush1.msra.mxu1 %v2677_v54 }
  0x73   :  { %625 = vmatprep.subr.mxu0 %v2681_v55  ;;  %696 = vmatprep.subr.mxu1 %v2683_v56  ;;  %v3663_v55 = vld [vmem:[#allocation25_spill] sm:$0xff] }
  0x74   :  { %626 = vmatpush1.msra.mxu0 %v2689_v57  ;;  %697 = vmatpush1.msra.mxu1 %v2691_v58 }
  0x75   :  { %627 = vmatprep.subr.mxu0 %v2700_v60  ;;  %698 = vmatprep.subr.mxu1 %v2702_v61 }
  0x76   :  { %628 = vmatpush1.msra.mxu0 %v2706_v62  ;;  %699 = vmatpush1.msra.mxu1 %v2708_v63 }
  0x77   :  { %629 = vmatprep.subr.mxu0 %v2712_v1  ;;  %700 = vmatprep.subr.mxu1 %v2714_v2 }
  0x78   :  { %630 = vmatpush1.msra.mxu0 %v2720_v3  ;;  %701 = vmatpush1.msra.mxu1 %v3663_v55 }
  0x79   :  { %631 = vmatprep.subr.mxu0 %v2731_v14  ;;  %702 = vmatprep.subr.mxu1 %v2733_v23  ;;  %v85_v23 = vlaneseq }
  0x7a   :  { %632 = vmatpush1.msra.mxu0 %v2737_v32  ;;  %703 = vmatpush1.msra.mxu1 %v2739_v41 }
  0x7b   :  { %633 = vmatprep.subr.mxu0 %v2743_v50  ;;  %704 = vmatprep.subr.mxu1 %v2745_v59  ;;  %v86_v32 = vshrl.u32 %v85_v23, 7 }
  0x7c   :  { %634 = vmatpush1.msra.mxu0 %v2749_v0  ;;  %667 = vmatprep.mubr.f32.mxu0 %v3662_v5  ;;  %v83_v0 = vld [vmem:[%s3546_s3] sm:$0xf] }
  0x7d   :  { %705 = vmatpush1.msra.mxu1 %v2753_v4  ;;  %738 = vmatprep.mubr.f32.mxu1 %v3662_v5  ;;  %v87_v50 = vsub.s32 0, %v86_v32  ;;  %v95_v59 = vsub.s32 2, %v86_v32  ;;  %v91_v5 = vsub.s32 1, %v86_v32 }
  0x7e   :  { %773 = vmatprep.subr.mxu0 %v2516_v6  ;;  %844 = vmatprep.subr.mxu1 %v2518_v7  ;;  %v99_v6 = vsub.s32 3, %v86_v32 }
  0x7f   :  { %v88_v3 = vrot.slane %v83_v0, %v87_v50  ;;  %v2842_v7 = vrot.slane %v83_v0, %v95_v59  ;;  %v92_v1 = vrot.slane %v83_v0, %v91_v5 }
  0x80   :  { %v2844_v63 = vrot.slane %v83_v0, %v99_v6 }
  0xec   :  { %v2831_v14 = vpop.f32.mrf.mxu0  ;;  %v2833_v41 = vpop.f32.mrf.mxu1 }
  0xee   :  { %v2838_v55 = vpop.f32.mrf.mxu0  ;;  %v2840_v4 = vpop.f32.mrf.mxu1 }
  0xf2   :  { %v215_v23 = vpop.f32.mrf.mxu0  ;;  %v328_v2 = vpop.f32.mrf.mxu1 }
  0xf3   :  { %v2846_v62 = vadd.f32 %v215_v23, %v88_v3  ;;  %v2849_v61 = vadd.f32 %v328_v2, %v2842_v7 }
  0xf4   :  { %v217_v60 = vpop.f32.mrf.mxu0  ;;  %v330_v58 = vpop.f32.mrf.mxu1 }
  0xf5   :  { %3664 = vst [vmem:[#allocation34_spill] sm:$0xff] %v2846_v62  ;;  %3665 = vst [vmem:[#allocation35_spill] sm:$0xff] %v2849_v61  ;;  %v2851_v57 = vadd.f32 %v217_v60, %v92_v1  ;;  %v2854_v56 = vadd.f32 %v330_v58, %v2844_v63 }
  0xf7   :  { %3666 = vst [vmem:[#allocation36_spill] sm:$0xff] %v2851_v57  ;;  %3667 = vst [vmem:[#allocation37_spill] sm:$0xff] %v2854_v56 }
  0xf8   :  { %v221_v32 = vpop.f32.mrf.mxu0  ;;  %v334_v50 = vpop.f32.mrf.mxu1 }
  0xf9   :  { %v2856_v59 = vadd.f32 %v221_v32, %v88_v3  ;;  %v2859_v5 = vadd.f32 %v334_v50, %v2842_v7 }
  0xfa   :  { %v223_v0 = vpop.f32.mrf.mxu0  ;;  %v336_v6 = vpop.f32.mrf.mxu1 }
  0xfb   :  { %3668 = vst [vmem:[#allocation38_spill] sm:$0xff] %v2856_v59  ;;  %3669 = vst [vmem:[#allocation39_spill] sm:$0xff] %v2859_v5  ;;  %v2861_v23 = vadd.f32 %v223_v0, %v92_v1  ;;  %v2864_v2 = vadd.f32 %v336_v6, %v2844_v63 }
  0xfd   :  { %3670 = vst [vmem:[#allocation40_spill] sm:$0xff] %v2861_v23  ;;  %3671 = vst [vmem:[#allocation41_spill] sm:$0xff] %v2864_v2 }
  0xfe   :  { %v227_v61 = vpop.f32.mrf.mxu0  ;;  %v340_v60 = vpop.f32.mrf.mxu1 }
  0xff   :  { %v2866_v57 = vadd.f32 %v227_v61, %v88_v3  ;;  %v2869_v58 = vadd.f32 %v340_v60, %v2842_v7 }
 0x100   :  { %v229_v56 = vpop.f32.mrf.mxu0  ;;  %v342_v32 = vpop.f32.mrf.mxu1 }
 0x101   :  { %3672 = vst [vmem:[#allocation42_spill] sm:$0xff] %v2866_v57  ;;  %3673 = vst [vmem:[#allocation43_spill] sm:$0xff] %v2869_v58  ;;  %v2871_v59 = vadd.f32 %v229_v56, %v92_v1  ;;  %v2874_v50 = vadd.f32 %v342_v32, %v2844_v63 }
 0x103   :  { %3674 = vst [vmem:[#allocation44_spill] sm:$0xff] %v2871_v59  ;;  %3675 = vst [vmem:[#allocation45_spill] sm:$0xff] %v2874_v50 }
 0x104   :  { %v233_v5 = vpop.f32.mrf.mxu0  ;;  %v346_v0 = vpop.f32.mrf.mxu1 }
 0x105   :  { %v2876_v23 = vadd.f32 %v233_v5, %v88_v3  ;;  %v2879_v6 = vadd.f32 %v346_v0, %v2842_v7 }
 0x106   :  { %v235_v2 = vpop.f32.mrf.mxu0  ;;  %v348_v61 = vpop.f32.mrf.mxu1 }
 0x107   :  { %3676 = vst [vmem:[#allocation46_spill] sm:$0xff] %v2876_v23  ;;  %3677 = vst [vmem:[#allocation47_spill] sm:$0xff] %v2879_v6  ;;  %v2881_v57 = vadd.f32 %v235_v2, %v92_v1  ;;  %v2884_v60 = vadd.f32 %v348_v61, %v2844_v63 }
 0x109   :  { %3678 = vst [vmem:[#allocation48_spill] sm:$0xff] %v2881_v57  ;;  %3679 = vst [vmem:[#allocation49_spill] sm:$0xff] %v2884_v60 }
 0x10a   :  { %v239_v58 = vpop.f32.mrf.mxu0  ;;  %v352_v56 = vpop.f32.mrf.mxu1 }
 0x10b   :  { %v2886_v59 = vadd.f32 %v239_v58, %v88_v3  ;;  %v2889_v32 = vadd.f32 %v352_v56, %v2842_v7 }
 0x10c   :  { %v241_v50 = vpop.f32.mrf.mxu0  ;;  %v354_v5 = vpop.f32.mrf.mxu1 }
 0x10d   :  { %3680 = vst [vmem:[#allocation50_spill] sm:$0xff] %v2886_v59  ;;  %3681 = vst [vmem:[#allocation51_spill] sm:$0xff] %v2889_v32  ;;  %v2891_v23 = vadd.f32 %v241_v50, %v92_v1  ;;  %v2894_v0 = vadd.f32 %v354_v5, %v2844_v63 }
 0x10f   :  { %3682 = vst [vmem:[#allocation52_spill] sm:$0xff] %v2891_v23  ;;  %3683 = vst [vmem:[#allocation53_spill] sm:$0xff] %v2894_v0 }
 0x110   :  { %v245_v6 = vpop.f32.mrf.mxu0  ;;  %v358_v2 = vpop.f32.mrf.mxu1 }
 0x111   :  { %v2896_v57 = vadd.f32 %v245_v6, %v88_v3  ;;  %v2899_v61 = vadd.f32 %v358_v2, %v2842_v7 }
 0x112   :  { %v247_v60 = vpop.f32.mrf.mxu0  ;;  %v360_v58 = vpop.f32.mrf.mxu1 }
 0x113   :  { %3684 = vst [vmem:[#allocation54_spill] sm:$0xff] %v2896_v57  ;;  %3685 = vst [vmem:[#allocation55_spill] sm:$0xff] %v2899_v61  ;;  %v2901_v59 = vadd.f32 %v247_v60, %v92_v1  ;;  %v2904_v56 = vadd.f32 %v360_v58, %v2844_v63  ;;  %v210_v60 = vadd.f32 %v2831_v14, %v88_v3 }
 0x114   :  { %v212_v58 = vadd.f32 %v2838_v55, %v92_v1 }
 0x115   :  { %3686 = vst [vmem:[#allocation56_spill] sm:$0xff] %v2901_v59  ;;  %3687 = vst [vmem:[#allocation57_spill] sm:$0xff] %v2904_v56 }
 0x116   :  { %v251_v32 = vpop.f32.mrf.mxu0  ;;  %v364_v50 = vpop.f32.mrf.mxu1 }
 0x117   :  { %v2906_v23 = vadd.f32 %v251_v32, %v88_v3  ;;  %v2909_v5 = vadd.f32 %v364_v50, %v2842_v7 }
 0x118   :  { %v253_v0 = vpop.f32.mrf.mxu0  ;;  %v366_v6 = vpop.f32.mrf.mxu1 }
 0x119   :  { %3688 = vst [vmem:[#allocation58_spill] sm:$0xff] %v2906_v23  ;;  %3689 = vst [vmem:[#allocation59_spill] sm:$0xff] %v2909_v5  ;;  %v2911_v57 = vadd.f32 %v253_v0, %v92_v1  ;;  %v2914_v2 = vadd.f32 %v366_v6, %v2844_v63  ;;  %v325_v0 = vadd.f32 %v2840_v4, %v2844_v63 }
 0x11a   :  { %v323_v6 = vadd.f32 %v2833_v41, %v2842_v7 }
 0x11b   :  { %3690 = vst [vmem:[#allocation60_spill] sm:$0xff] %v2911_v57  ;;  %3691 = vst [vmem:[#allocation61_spill] sm:$0xff] %v2914_v2 }
 0x11c   :  { %v499_v61 = vpop.f32.mrf.mxu0  ;;  %v570_v23 = vpop.f32.mrf.mxu1 }
 0x11d   :  { %v575_v56 = vadd.f32 %v499_v61, %v210_v60  ;;  %v577_v2 = vadd.f32 %v570_v23, %v323_v6  ;;  %v3692_v23 = vld [vmem:[#allocation14_spill] sm:$0xff]  ;;  %v3697_v6 = vld [vmem:[#allocation19_spill] sm:$0xff] }
 0x11e   :  { %v501_v59 = vpop.f32.mrf.mxu0  ;;  %v572_v5 = vpop.f32.mrf.mxu1 }
 0x11f   :  { %v2017_v62 = vmul.f32 -1.442695, %v575_v56  ;;  %v576_v32 = vadd.f32 %v501_v59, %v212_v58  ;;  %v578_v57 = vadd.f32 %v572_v5, %v325_v0  ;;  %v3696_v0 = vld [vmem:[#allocation18_spill] sm:$0xff] }
 0x121   :  { %2157 = vpow2.f32 %v2017_v62  ;;  %v2018_v50 = vmul.f32 -1.442695, %v576_v32  ;;  %v2019_v3 = vmul.f32 -1.442695, %v578_v57  ;;  %v3694_v32 = vld [vmem:[#allocation16_spill] sm:$0xff] }
 0x123   :  { %2159 = vpow2.f32 %v2018_v50  ;;  %v3695_v50 = vld [vmem:[#allocation17_spill] sm:$0xff] }
 0x124   :  { %2161 = vpow2.f32 %v2019_v3  ;;  %v3698_v3 = vld [vmem:[#allocation20_spill] sm:$0xff] }
 0x12e   :  { %v2158_v14 = vpop.eup %2157 }
 0x12f   :  { %v582_v55 = vadd.f32 1.0, %v2158_v14  ;;  %v3699_v14 = vld [vmem:[#allocation21_spill] sm:$0xff] }
 0x130   :  { %v2160_v1 = vpop.eup %2159 }
 0x131   :  { %2163 = vrcp.f32 %v582_v55  ;;  %v588_v59 = vadd.f32 1.0, %v2160_v1  ;;  %v2162_v62 = vpop.eup %2161  ;;  %v3700_v55 = vld [vmem:[#allocation22_spill] sm:$0xff]  ;;  %v3701_v1 = vld [vmem:[#allocation23_spill] sm:$0xff] }
 0x132   :  { %2165 = vtanh.f32 %v577_v2  ;;  %v595_v58 = vadd.f32 1.0, %v2162_v62  ;;  %v3693_v2 = vld [vmem:[#allocation15_spill] sm:$0xff]  ;;  %v3703_v62 = vld [vmem:[#allocation25_spill] sm:$0xff] }
 0x133   :  { %2167 = vrcp.f32 %v588_v59  ;;  %v3702_v59 = vld [vmem:[#allocation24_spill] sm:$0xff] }
 0x134   :  { %2169 = vrcp.f32 %v595_v58  ;;  %v3707_v58 = vld [vmem:[#allocation29_spill] sm:$0xff] }
 0x13e   :  { %v2164_v61 = vpop.eup %2163 }
 0x13f   :  { %v2166_v56 = vpop.eup %2165 }
 0x140   :  { %v2168_v60 = vpop.eup %2167  ;;  %v599_v4 = vmul.f32 %v2166_v56, %v2164_v61  ;;  %v3704_v61 = vld [vmem:[#allocation26_spill] sm:$0xff]  ;;  %v3705_v56 = vld [vmem:[#allocation27_spill] sm:$0xff] }
 0x141   :  { %v598_v63 = vmul.f32 0.0, %v2168_v60  ;;  %v2170_v7 = vpop.eup %2169  ;;  %v3706_v60 = vld [vmem:[#allocation28_spill] sm:$0xff] }
 0x143   :  { %v2922_v5 = vadd.f32 %v599_v4, %v598_v63  ;;  %v3708_v63 = vld [vmem:[#allocation30_spill] sm:$0xff]  ;;  %v3709_v4 = vld [vmem:[#allocation31_spill] sm:$0xff] }
 0x145   :  { %2171 = vtanh.f32 %v2922_v5 }
 0x152   :  { %v2172_v57 = vpop.eup %2171 }
 0x153   :  { %v602_v41 = vmul.f32 %v2172_v57, %v2170_v7  ;;  %v3710_v7 = vld [vmem:[#allocation32_spill] sm:$0xff]  ;;  %v3711_v57 = vmov 0.0  }
 0x155   :  { %668 = vmatmul.mubr.f32.vlgmr.msra.gmra.mxu0 %v602_v41  ;;  %739 = vmatmul.mubr.f32.vlgmr.msra.gmra.mxu1 %v602_v41  ;;  %v3712_v41 = vld [vmem:[#allocation33_spill] sm:$0xff] }
 0x156   :  { %774 = vmatpush1.msra.mxu0 %v2520_v8  ;;  %845 = vmatpush1.msra.mxu1 %v2522_v9 }
 0x157   :  { %775 = vmatprep.subr.mxu0 %v2526_v10  ;;  %846 = vmatprep.subr.mxu1 %v2528_v11 }
 0x158   :  { %776 = vmatpush1.msra.mxu0 %v2534_v12  ;;  %847 = vmatpush1.msra.mxu1 %v2536_v13 }
 0x159   :  { %777 = vmatprep.subr.mxu0 %v2545_v15  ;;  %848 = vmatprep.subr.mxu1 %v2547_v16 }
 0x15a   :  { %778 = vmatpush1.msra.mxu0 %v2551_v17  ;;  %849 = vmatpush1.msra.mxu1 %v2553_v18 }
 0x15b   :  { %779 = vmatprep.subr.mxu0 %v2557_v19  ;;  %850 = vmatprep.subr.mxu1 %v2559_v20 }
 0x15c   :  { %780 = vmatpush1.msra.mxu0 %v2565_v21  ;;  %851 = vmatpush1.msra.mxu1 %v2567_v22 }
 0x15d   :  { %781 = vmatprep.subr.mxu0 %v2576_v24  ;;  %852 = vmatprep.subr.mxu1 %v2578_v25 }
 0x15e   :  { %782 = vmatpush1.msra.mxu0 %v2582_v26  ;;  %853 = vmatpush1.msra.mxu1 %v2584_v27 }
 0x15f   :  { %783 = vmatprep.subr.mxu0 %v2588_v28  ;;  %854 = vmatprep.subr.mxu1 %v2590_v29 }
 0x160   :  { %784 = vmatpush1.msra.mxu0 %v2596_v30  ;;  %855 = vmatpush1.msra.mxu1 %v2598_v31 }
 0x161   :  { %785 = vmatprep.subr.mxu0 %v2607_v33  ;;  %856 = vmatprep.subr.mxu1 %v2609_v34 }
 0x162   :  { %786 = vmatpush1.msra.mxu0 %v2613_v35  ;;  %857 = vmatpush1.msra.mxu1 %v2615_v36 }
 0x163   :  { %787 = vmatprep.subr.mxu0 %v2619_v37  ;;  %858 = vmatprep.subr.mxu1 %v2621_v38 }
 0x164   :  { %788 = vmatpush1.msra.mxu0 %v2627_v39  ;;  %859 = vmatpush1.msra.mxu1 %v2629_v40 }
 0x165   :  { %789 = vmatprep.subr.mxu0 %v2638_v42  ;;  %860 = vmatprep.subr.mxu1 %v2640_v43 }
 0x166   :  { %790 = vmatpush1.msra.mxu0 %v2644_v44  ;;  %861 = vmatpush1.msra.mxu1 %v2646_v45 }
 0x167   :  { %791 = vmatprep.subr.mxu0 %v2650_v46  ;;  %862 = vmatprep.subr.mxu1 %v2652_v47 }
 0x168   :  { %792 = vmatpush1.msra.mxu0 %v2658_v48  ;;  %863 = vmatpush1.msra.mxu1 %v2660_v49 }
 0x169   :  { %793 = vmatprep.subr.mxu0 %v2669_v51  ;;  %864 = vmatprep.subr.mxu1 %v2671_v52 }
 0x16a   :  { %794 = vmatpush1.msra.mxu0 %v2675_v53  ;;  %865 = vmatpush1.msra.mxu1 %v2677_v54 }
 0x16b   :  { %795 = vmatprep.subr.mxu0 %v3692_v23  ;;  %866 = vmatprep.subr.mxu1 %v3693_v2 }
 0x16c   :  { %796 = vmatpush1.msra.mxu0 %v3694_v32  ;;  %867 = vmatpush1.msra.mxu1 %v3695_v50 }
 0x16d   :  { %797 = vmatprep.subr.mxu0 %v3696_v0  ;;  %868 = vmatprep.subr.mxu1 %v3697_v6  ;;  %v3718_v6 = vld [vmem:[#allocation35_spill] sm:$0xff] }
 0x16e   :  { %798 = vmatpush1.msra.mxu0 %v3698_v3  ;;  %869 = vmatpush1.msra.mxu1 %v3699_v14  ;;  %v3717_v3 = vld [vmem:[#allocation37_spill] sm:$0xff] }
 0x16f   :  { %799 = vmatprep.subr.mxu0 %v3700_v55  ;;  %870 = vmatprep.subr.mxu1 %v3701_v1 }
 0x170   :  { %800 = vmatpush1.msra.mxu0 %v3702_v59  ;;  %871 = vmatpush1.msra.mxu1 %v3703_v62  ;;  %v3713_v62 = vld [vmem:[#allocation12_spill] sm:$0xff] }
 0x171   :  { %801 = vmatprep.subr.mxu0 %v3704_v61  ;;  %872 = vmatprep.subr.mxu1 %v3705_v56  ;;  %v3714_v61 = vld [vmem:[#allocation13_spill] sm:$0xff] }
 0x172   :  { %802 = vmatpush1.msra.mxu0 %v3706_v60  ;;  %873 = vmatpush1.msra.mxu1 %v3707_v58  ;;  %v3715_v60 = vld [vmem:[#allocation34_spill] sm:$0xff] }
 0x173   :  { %803 = vmatprep.subr.mxu0 %v3708_v63  ;;  %874 = vmatprep.subr.mxu1 %v3709_v4  ;;  %v3716_v63 = vld [vmem:[#allocation36_spill] sm:$0xff] }
 0x174   :  { %804 = vmatpush1.msra.mxu0 %v3710_v7  ;;  %837 = vmatprep.mubr.f32.mxu0 %v3711_v57 }
 0x175   :  { %875 = vmatpush1.msra.mxu1 %v3712_v41  ;;  %908 = vmatprep.mubr.f32.mxu1 %v3711_v57 }
 0x176   :  { %943 = vmatprep.subr.mxu0 %v3713_v62  ;;  %1014 = vmatprep.subr.mxu1 %v3714_v61 }
 0x215   :  { %v669_v56 = vpop.f32.mrf.mxu0  ;;  %v740_v4 = vpop.f32.mrf.mxu1 }
 0x216   :  { %v745_v59 = vadd.f32 %v669_v56, %v3715_v60  ;;  %v747_v57 = vadd.f32 %v740_v4, %v3718_v6 }
 0x217   :  { %v671_v58 = vpop.f32.mrf.mxu0  ;;  %v742_v14 = vpop.f32.mrf.mxu1 }
 0x218   :  { %v2020_v1 = vmul.f32 -1.442695, %v745_v59  ;;  %v746_v55 = vadd.f32 %v671_v58, %v3716_v63  ;;  %v748_v41 = vadd.f32 %v742_v14, %v3717_v3 }
 0x21a   :  { %2173 = vpow2.f32 %v2020_v1  ;;  %v2021_v7 = vmul.f32 -1.442695, %v746_v55  ;;  %v2022_v0 = vmul.f32 -1.442695, %v748_v41 }
 0x21c   :  { %2175 = vpow2.f32 %v2021_v7 }
 0x21d   :  { %2177 = vtanh.f32 %v747_v57 }
 0x21e   :  { %2179 = vpow2.f32 %v2022_v0 }
 0x227   :  { %v2174_v62 = vpop.eup %2173 }
 0x228   :  { %v752_v50 = vadd.f32 1.0, %v2174_v62 }
 0x229   :  { %v2176_v61 = vpop.eup %2175 }
 0x22a   :  { %2181 = vrcp.f32 %v752_v50  ;;  %v758_v56 = vadd.f32 1.0, %v2176_v61  ;;  %v2178_v59 = vpop.eup %2177  ;;  %v3740_v50 = vld [vmem:[#allocation40_spill] sm:$0xff]  ;;  %v3741_v61 = vld [vmem:[#allocation41_spill] sm:$0xff] }
 0x22b   :  { %v2180_v60 = vpop.eup %2179 }
 0x22c   :  { %2183 = vrcp.f32 %v758_v56  ;;  %v765_v63 = vadd.f32 1.0, %v2180_v60 }
 0x22e   :  { %2185 = vrcp.f32 %v765_v63 }
 0x237   :  { %v2182_v1 = vpop.eup %2181 }
 0x238   :  { %v769_v58 = vmul.f32 %v2182_v1, %v2178_v59  ;;  %v3742_v59 = vld [vmem:[#allocation39_spill] sm:$0xff] }
 0x239   :  { %v2184_v55 = vpop.eup %2183 }
 0x23a   :  { %v768_v7 = vmul.f32 %v2184_v55, %v2922_v5 }
 0x23b   :  { %v2186_v6 = vpop.eup %2185 }
 0x23c   :  { %v2996_v3 = vadd.f32 %v769_v58, %v768_v7 }
 0x23e   :  { %2187 = vtanh.f32 %v2996_v3 }
 0x24b   :  { %v2188_v14 = vpop.eup %2187 }
 0x24c   :  { %v772_v4 = vmul.f32 %v2188_v14, %v2186_v6 }
 0x24e   :  { %838 = vmatmul.mubr.f32.vlgmr.msra.gmra.mxu0 %v772_v4  ;;  %909 = vmatmul.mubr.f32.vlgmr.msra.gmra.mxu1 %v772_v4 }
 0x24f   :  { %944 = vmatpush1.msra.mxu0 %v2520_v8  ;;  %1015 = vmatpush1.msra.mxu1 %v2522_v9  ;;  %v3719_v8 = vld [vmem:[#allocation17_spill] sm:$0xff]  ;;  %v3720_v9 = vld [vmem:[#allocation18_spill] sm:$0xff] }
 0x250   :  { %945 = vmatprep.subr.mxu0 %v2526_v10  ;;  %1016 = vmatprep.subr.mxu1 %v2528_v11  ;;  %v3721_v10 = vld [vmem:[#allocation19_spill] sm:$0xff]  ;;  %v3722_v11 = vld [vmem:[#allocation20_spill] sm:$0xff] }
 0x251   :  { %946 = vmatpush1.msra.mxu0 %v2534_v12  ;;  %1017 = vmatpush1.msra.mxu1 %v2536_v13  ;;  %v3723_v12 = vld [vmem:[#allocation21_spill] sm:$0xff]  ;;  %v3724_v13 = vld [vmem:[#allocation22_spill] sm:$0xff] }
 0x252   :  { %947 = vmatprep.subr.mxu0 %v2545_v15  ;;  %1018 = vmatprep.subr.mxu1 %v2547_v16  ;;  %v3725_v15 = vld [vmem:[#allocation23_spill] sm:$0xff]  ;;  %v3726_v16 = vld [vmem:[#allocation24_spill] sm:$0xff] }
 0x253   :  { %948 = vmatpush1.msra.mxu0 %v2551_v17  ;;  %1019 = vmatpush1.msra.mxu1 %v2553_v18  ;;  %v3727_v17 = vld [vmem:[#allocation25_spill] sm:$0xff]  ;;  %v3728_v18 = vld [vmem:[#allocation26_spill] sm:$0xff] }
 0x254   :  { %949 = vmatprep.subr.mxu0 %v2557_v19  ;;  %1020 = vmatprep.subr.mxu1 %v2559_v20  ;;  %v3729_v19 = vld [vmem:[#allocation27_spill] sm:$0xff]  ;;  %v3730_v20 = vld [vmem:[#allocation28_spill] sm:$0xff] }
 0x255   :  { %950 = vmatpush1.msra.mxu0 %v2565_v21  ;;  %1021 = vmatpush1.msra.mxu1 %v2567_v22  ;;  %v3731_v21 = vld [vmem:[#allocation29_spill] sm:$0xff]  ;;  %v3732_v22 = vld [vmem:[#allocation30_spill] sm:$0xff] }
 0x256   :  { %951 = vmatprep.subr.mxu0 %v2576_v24  ;;  %1022 = vmatprep.subr.mxu1 %v2578_v25  ;;  %v3733_v24 = vld [vmem:[#allocation31_spill] sm:$0xff]  ;;  %v3734_v25 = vld [vmem:[#allocation32_spill] sm:$0xff] }
 0x257   :  { %952 = vmatpush1.msra.mxu0 %v2582_v26  ;;  %1023 = vmatpush1.msra.mxu1 %v2584_v27  ;;  %v3735_v26 = vmov 0.0   ;;  %v3736_v27 = vld [vmem:[#allocation33_spill] sm:$0xff] }
 0x258   :  { %953 = vmatprep.subr.mxu0 %v2588_v28  ;;  %1024 = vmatprep.subr.mxu1 %v2590_v29  ;;  %v3063_v28 = vld [vmem:[#allocation2 + $0x1e8] sm:$0xff]  ;;  %v3066_v29 = vld [vmem:[#allocation2 + $0x1f8] sm:$0xff] }
 0x259   :  { %954 = vmatpush1.msra.mxu0 %v2596_v30  ;;  %1025 = vmatpush1.msra.mxu1 %v2598_v31  ;;  %3737 = vst [vmem:[#allocation14_spill] sm:$0xff] %v3063_v28  ;;  %3738 = vst [vmem:[#allocation15_spill] sm:$0xff] %v3066_v29  ;;  %v3739_v31 = vld [vmem:[#allocation38_spill] sm:$0xff] }
 0x25a   :  { %955 = vmatprep.subr.mxu0 %v2607_v33  ;;  %1026 = vmatprep.subr.mxu1 %v2609_v34 }
 0x25b   :  { %956 = vmatpush1.msra.mxu0 %v2613_v35  ;;  %1027 = vmatpush1.msra.mxu1 %v2615_v36 }
 0x25c   :  { %957 = vmatprep.subr.mxu0 %v2619_v37  ;;  %1028 = vmatprep.subr.mxu1 %v2621_v38 }
 0x25d   :  { %958 = vmatpush1.msra.mxu0 %v2627_v39  ;;  %1029 = vmatpush1.msra.mxu1 %v2629_v40 }
 0x25e   :  { %959 = vmatprep.subr.mxu0 %v2638_v42  ;;  %1030 = vmatprep.subr.mxu1 %v2640_v43 }
 0x25f   :  { %960 = vmatpush1.msra.mxu0 %v2644_v44  ;;  %1031 = vmatpush1.msra.mxu1 %v2646_v45 }
 0x260   :  { %961 = vmatprep.subr.mxu0 %v2650_v46  ;;  %1032 = vmatprep.subr.mxu1 %v2652_v47 }
 0x261   :  { %962 = vmatpush1.msra.mxu0 %v2658_v48  ;;  %1033 = vmatpush1.msra.mxu1 %v2660_v49 }
 0x262   :  { %963 = vmatprep.subr.mxu0 %v2669_v51  ;;  %1034 = vmatprep.subr.mxu1 %v2671_v52 }
 0x263   :  { %964 = vmatpush1.msra.mxu0 %v2675_v53  ;;  %1035 = vmatpush1.msra.mxu1 %v2677_v54 }
 0x264   :  { %965 = vmatprep.subr.mxu0 %v3692_v23  ;;  %1036 = vmatprep.subr.mxu1 %v3693_v2 }
 0x265   :  { %966 = vmatpush1.msra.mxu0 %v3694_v32  ;;  %1037 = vmatpush1.msra.mxu1 %v3719_v8 }
 0x266   :  { %967 = vmatprep.subr.mxu0 %v3720_v9  ;;  %1038 = vmatprep.subr.mxu1 %v3721_v10 }
 0x267   :  { %968 = vmatpush1.msra.mxu0 %v3722_v11  ;;  %1039 = vmatpush1.msra.mxu1 %v3723_v12 }
 0x268   :  { %969 = vmatprep.subr.mxu0 %v3724_v13  ;;  %1040 = vmatprep.subr.mxu1 %v3725_v15 }
 0x269   :  { %970 = vmatpush1.msra.mxu0 %v3726_v16  ;;  %1041 = vmatpush1.msra.mxu1 %v3727_v17 }
 0x26a   :  { %971 = vmatprep.subr.mxu0 %v3728_v18  ;;  %1042 = vmatprep.subr.mxu1 %v3729_v19 }
 0x26b   :  { %972 = vmatpush1.msra.mxu0 %v3730_v20  ;;  %1043 = vmatpush1.msra.mxu1 %v3731_v21 }
 0x26c   :  { %973 = vmatprep.subr.mxu0 %v3732_v22  ;;  %1044 = vmatprep.subr.mxu1 %v3733_v24 }
 0x26d   :  { %974 = vmatpush1.msra.mxu0 %v3734_v25  ;;  %1007 = vmatprep.mubr.f32.mxu0 %v3735_v26 }
 0x26e   :  { %1045 = vmatpush1.msra.mxu1 %v3736_v27  ;;  %1078 = vmatprep.mubr.f32.mxu1 %v3735_v26 }
 0x26f   :  { %1113 = vmatprep.subr.mxu0 %v3063_v28  ;;  %1184 = vmatprep.subr.mxu1 %v3066_v29 }
 0x30e   :  { %v839_v30 = vpop.f32.mrf.mxu0  ;;  %v910_v57 = vpop.f32.mrf.mxu1 }
 0x30f   :  { %v915_v33 = vadd.f32 %v839_v30, %v3739_v31  ;;  %v917_v60 = vadd.f32 %v910_v57, %v3742_v59  ;;  %v3092_v59 = vld [vmem:[#allocation2 + $0x1d0] sm:$0xff] }
 0x310   :  { %v841_v34 = vpop.f32.mrf.mxu0  ;;  %v912_v62 = vpop.f32.mrf.mxu1 }
 0x311   :  { %v2023_v5 = vmul.f32 -1.442695, %v915_v33  ;;  %v916_v0 = vadd.f32 %v841_v34, %v3740_v50  ;;  %v918_v56 = vadd.f32 %v912_v62, %v3741_v61  ;;  %v3080_v62 = vld [vmem:[#allocation2 + $0x1f0] sm:$0xff]  ;;  %v3083_v61 = vld [vmem:[#allocation2 + $0x1c8] sm:$0xff] }
 0x313   :  { %2189 = vpow2.f32 %v2023_v5  ;;  %v2024_v41 = vmul.f32 -1.442695, %v916_v0  ;;  %v2025_v1 = vmul.f32 -1.442695, %v918_v56  ;;  %v3089_v56 = vld [vmem:[#allocation2 + $0x1c0] sm:$0xff] }
 0x315   :  { %2191 = vpow2.f32 %v2024_v41  ;;  %v3077_v41 = vld [vmem:[#allocation2 + $0x1e0] sm:$0xff] }
 0x316   :  { %2193 = vtanh.f32 %v917_v60  ;;  %v3095_v60 = vld [vmem:[#allocation2 + $0x1a8] sm:$0xff] }
 0x317   :  { %2195 = vpow2.f32 %v2025_v1  ;;  %v3098_v1 = vld [vmem:[#allocation2 + $0x1b8] sm:$0xff] }
 0x320   :  { %v2190_v58 = vpop.eup %2189 }
 0x321   :  { %v922_v55 = vadd.f32 1.0, %v2190_v58  ;;  %v3101_v58 = vld [vmem:[#allocation2 + $0x1a0] sm:$0xff] }
 0x322   :  { %v2192_v63 = vpop.eup %2191 }
 0x323   :  { %2197 = vrcp.f32 %v922_v55  ;;  %v928_v7 = vadd.f32 1.0, %v2192_v63  ;;  %v2194_v6 = vpop.eup %2193  ;;  %v3104_v55 = vld [vmem:[#allocation2 + $0x1b0] sm:$0xff]  ;;  %v3107_v63 = vld [vmem:[#allocation2 + $0x188] sm:$0xff] }
 0x324   :  { %v2196_v14 = vpop.eup %2195 }
 0x325   :  { %2199 = vrcp.f32 %v928_v7  ;;  %v935_v33 = vadd.f32 1.0, %v2196_v14  ;;  %v3110_v7 = vld [vmem:[#allocation2 + $0x198] sm:$0xff]  ;;  %v3116_v14 = vld [vmem:[#allocation2 + $0x190] sm:$0xff] }
 0x327   :  { %2201 = vrcp.f32 %v935_v33  ;;  %v3128_v33 = vld [vmem:[#allocation2 + $0x170] sm:$0xff] }
 0x328   :  { %3744 = vst [vmem:[#allocation12_spill] sm:$0xff] %v3128_v33 }
 0x330   :  { %v2198_v4 = vpop.eup %2197 }
 0x331   :  { %v939_v30 = vmul.f32 %v2198_v4, %v2194_v6  ;;  %v3113_v6 = vld [vmem:[#allocation2 + $0x180] sm:$0xff]  ;;  %v3119_v4 = vld [vmem:[#allocation2 + $0x168] sm:$0xff] }
 0x332   :  { %v2200_v31 = vpop.eup %2199 }
 0x333   :  { %v938_v34 = vmul.f32 %v2200_v31, %v2996_v3  ;;  %v3086_v3 = vld [vmem:[#allocation2 + $0x1d8] sm:$0xff]  ;;  %v3125_v31 = vld [vmem:[#allocation2 + $0x160] sm:$0xff] }
 0x334   :  { %v2202_v50 = vpop.eup %2201  ;;  %3743 = vst [vmem:[#allocation16_spill] sm:$0xff] %v3125_v31 }
 0x335   :  { %v3074_v5 = vadd.f32 %v939_v30, %v938_v34  ;;  %v3122_v30 = vld [vmem:[#allocation2 + $0x178] sm:$0xff]  ;;  %v3131_v34 = vld [vmem:[#allocation2 + $0x148] sm:$0xff] }
 0x337   :  { %2203 = vtanh.f32 %v3074_v5 }
 0x344   :  { %v2204_v0 = vpop.eup %2203 }
 0x345   :  { %v942_v57 = vmul.f32 %v2204_v0, %v2202_v50  ;;  %v3134_v50 = vld [vmem:[#allocation2 + $0x158] sm:$0xff]  ;;  %v3137_v0 = vld [vmem:[#allocation2 + $0x140] sm:$0xff] }
 0x347   :  { %1008 = vmatmul.mubr.f32.vlgmr.msra.gmra.mxu0 %v942_v57  ;;  %1079 = vmatmul.mubr.f32.vlgmr.msra.gmra.mxu1 %v942_v57  ;;  %v3140_v57 = vld [vmem:[#allocation2 + $0x150] sm:$0xff] }
 0x348   :  { %1114 = vmatpush1.msra.mxu0 %v3077_v41  ;;  %1185 = vmatpush1.msra.mxu1 %v3080_v62 }
 0x349   :  { %1115 = vmatprep.subr.mxu0 %v3083_v61  ;;  %1186 = vmatprep.subr.mxu1 %v3086_v3 }
 0x34a   :  { %1116 = vmatpush1.msra.mxu0 %v3089_v56  ;;  %1187 = vmatpush1.msra.mxu1 %v3092_v59 }
 0x34b   :  { %1117 = vmatprep.subr.mxu0 %v3095_v60  ;;  %1188 = vmatprep.subr.mxu1 %v3098_v1 }
 0x34c   :  { %1118 = vmatpush1.msra.mxu0 %v3101_v58  ;;  %1189 = vmatpush1.msra.mxu1 %v3104_v55 }
 0x34d   :  { %1119 = vmatprep.subr.mxu0 %v3107_v63  ;;  %1190 = vmatprep.subr.mxu1 %v3110_v7 }
 0x34e   :  { %1120 = vmatpush1.msra.mxu0 %v3113_v6  ;;  %1191 = vmatpush1.msra.mxu1 %v3116_v14 }
 0x34f   :  { %1121 = vmatprep.subr.mxu0 %v3119_v4  ;;  %1192 = vmatprep.subr.mxu1 %v3122_v30 }
 0x350   :  { %1122 = vmatpush1.msra.mxu0 %v3125_v31  ;;  %1193 = vmatpush1.msra.mxu1 %v3128_v33  ;;  %v3143_v31 = vld [vmem:[#allocation2 + $0x128] sm:$0xff]  ;;  %v3146_v33 = vld [vmem:[#allocation2 + $0x138] sm:$0xff] }
 0x351   :  { %1123 = vmatprep.subr.mxu0 %v3131_v34  ;;  %1194 = vmatprep.subr.mxu1 %v3134_v50 }
 0x352   :  { %1124 = vmatpush1.msra.mxu0 %v3137_v0  ;;  %1195 = vmatpush1.msra.mxu1 %v3140_v57 }
 0x353   :  { %1125 = vmatprep.subr.mxu0 %v3143_v31  ;;  %1196 = vmatprep.subr.mxu1 %v3146_v33 }
 0x354   :  { %1126 = vmatpush1.msra.mxu0 %v2613_v35  ;;  %1197 = vmatpush1.msra.mxu1 %v2615_v36  ;;  %v3745_v36 = vld [vmem:[#allocation42_spill] sm:$0xff] }
 0x355   :  { %1127 = vmatprep.subr.mxu0 %v2619_v37  ;;  %1198 = vmatprep.subr.mxu1 %v2621_v38 }
 0x356   :  { %1128 = vmatpush1.msra.mxu0 %v2627_v39  ;;  %1199 = vmatpush1.msra.mxu1 %v2629_v40  ;;  %v3746_v40 = vld [vmem:[#allocation44_spill] sm:$0xff] }
 0x357   :  { %1129 = vmatprep.subr.mxu0 %v2638_v42  ;;  %1200 = vmatprep.subr.mxu1 %v2640_v43 }
 0x358   :  { %1130 = vmatpush1.msra.mxu0 %v2644_v44  ;;  %1201 = vmatpush1.msra.mxu1 %v2646_v45 }
 0x359   :  { %1131 = vmatprep.subr.mxu0 %v2650_v46  ;;  %1202 = vmatprep.subr.mxu1 %v2652_v47  ;;  %v3747_v46 = vld [vmem:[#allocation45_spill] sm:$0xff] }
 0x35a   :  { %1132 = vmatpush1.msra.mxu0 %v2658_v48  ;;  %1203 = vmatpush1.msra.mxu1 %v2660_v49  ;;  %v3748_v48 = vld [vmem:[#allocation43_spill] sm:$0xff] }
 0x35b   :  { %1133 = vmatprep.subr.mxu0 %v2669_v51  ;;  %1204 = vmatprep.subr.mxu1 %v2671_v52 }
 0x35c   :  { %1134 = vmatpush1.msra.mxu0 %v2675_v53  ;;  %1205 = vmatpush1.msra.mxu1 %v2677_v54 }
 0x35d   :  { %1135 = vmatprep.subr.mxu0 %v3692_v23  ;;  %1206 = vmatprep.subr.mxu1 %v3693_v2 }
 0x35e   :  { %1136 = vmatpush1.msra.mxu0 %v3694_v32  ;;  %1207 = vmatpush1.msra.mxu1 %v3719_v8 }
 0x35f   :  { %1137 = vmatprep.subr.mxu0 %v3720_v9  ;;  %1208 = vmatprep.subr.mxu1 %v3721_v10 }
 0x360   :  { %1138 = vmatpush1.msra.mxu0 %v3722_v11  ;;  %1209 = vmatpush1.msra.mxu1 %v3723_v12 }
 0x361   :  { %1139 = vmatprep.subr.mxu0 %v3724_v13  ;;  %1210 = vmatprep.subr.mxu1 %v3725_v15 }
 0x362   :  { %1140 = vmatpush1.msra.mxu0 %v3726_v16  ;;  %1211 = vmatpush1.msra.mxu1 %v3727_v17 }
 0x363   :  { %1141 = vmatprep.subr.mxu0 %v3728_v18  ;;  %1212 = vmatprep.subr.mxu1 %v3729_v19  ;;  %v3749_v18 = vld [vmem:[#allocation16_spill] sm:$0xff] }
 0x364   :  { %1142 = vmatpush1.msra.mxu0 %v3730_v20  ;;  %1213 = vmatpush1.msra.mxu1 %v3731_v21  ;;  %v3750_v19 = vld [vmem:[#allocation12_spill] sm:$0xff]  ;;  %v3223_v20 = vld [vmem:[#allocation2 + $0x120] sm:$0xff]  ;;  %v3226_v21 = vld [vmem:[#allocation2 + $0x130] sm:$0xff] }
 0x365   :  { %1143 = vmatprep.subr.mxu0 %v3732_v22  ;;  %1214 = vmatprep.subr.mxu1 %v3733_v24  ;;  %v3229_v22 = vld [vmem:[#allocation2 + $0x108] sm:$0xff]  ;;  %v3232_v24 = vld [vmem:[#allocation2 + $0x118] sm:$0xff] }
 0x366   :  { %1144 = vmatpush1.msra.mxu0 %v3734_v25  ;;  %1177 = vmatprep.mubr.f32.mxu0 %v3735_v26  ;;  %v3235_v25 = vld [vmem:[#allocation2 + $0x100] sm:$0xff] }
 0x367   :  { %1215 = vmatpush1.msra.mxu1 %v3736_v27  ;;  %1248 = vmatprep.mubr.f32.mxu1 %v3735_v26  ;;  %v3238_v27 = vld [vmem:[#allocation2 + $0x110] sm:$0xff] }
 0x368   :  { %1283 = vmatprep.subr.mxu0 %v3063_v28  ;;  %1354 = vmatprep.subr.mxu1 %v3066_v29 }
 0x407   :  { %v1009_v35 = vpop.f32.mrf.mxu0  ;;  %v1080_v43 = vpop.f32.mrf.mxu1 }
 0x408   :  { %v1085_v37 = vadd.f32 %v1009_v35, %v3745_v36  ;;  %v1087_v49 = vadd.f32 %v1080_v43, %v3748_v48  ;;  %v3244_v35 = vld [vmem:[#allocation2 + $0xf8] sm:$0xff]  ;;  %v3247_v36 = vld [vmem:[#allocation2 + $0xe0] sm:$0xff]  ;;  %v3265_v43 = vld [vmem:[#allocation2 + $0xa8] sm:$0xff] }
 0x409   :  { %v1011_v38 = vpop.f32.mrf.mxu0  ;;  %v1082_v45 = vpop.f32.mrf.mxu1  ;;  %v3280_v48 = vld [vmem:[#allocation2 + $0x98] sm:$0xff] }
 0x40a   :  { %v2026_v39 = vmul.f32 -1.442695, %v1085_v37  ;;  %v1086_v42 = vadd.f32 %v1011_v38, %v3746_v40  ;;  %v1088_v47 = vadd.f32 %v1082_v45, %v3747_v46  ;;  %v3250_v37 = vld [vmem:[#allocation2 + $0xf0] sm:$0xff]  ;;  %v3253_v38 = vld [vmem:[#allocation2 + $0xc8] sm:$0xff]  ;;  %v3259_v40 = vld [vmem:[#allocation2 + $0xc0] sm:$0xff] }
 0x40b   :  { %v3271_v45 = vld [vmem:[#allocation2 + $0xa0] sm:$0xff]  ;;  %v3274_v46 = vld [vmem:[#allocation2 + $0xb0] sm:$0xff] }
 0x40c   :  { %2205 = vpow2.f32 %v2026_v39  ;;  %v2027_v44 = vmul.f32 -1.442695, %v1086_v42  ;;  %v2028_v51 = vmul.f32 -1.442695, %v1088_v47  ;;  %v3256_v39 = vld [vmem:[#allocation2 + $0xd8] sm:$0xff]  ;;  %v3262_v42 = vld [vmem:[#allocation2 + $0xd0] sm:$0xff] }
 0x40d   :  { %v3277_v47 = vld [vmem:[#allocation2 + $0x88] sm:$0xff] }
 0x40e   :  { %2207 = vpow2.f32 %v2027_v44  ;;  %v3268_v44 = vld [vmem:[#allocation2 + $0xb8] sm:$0xff] }
 0x40f   :  { %2209 = vtanh.f32 %v1087_v49  ;;  %v3283_v49 = vld [vmem:[#allocation2 + $0x80] sm:$0xff] }
 0x410   :  { %2211 = vpow2.f32 %v2028_v51  ;;  %v3286_v51 = vld [vmem:[#allocation2 + $0x90] sm:$0xff] }
 0x411   :  { %3751 = vst [vmem:[#allocation13_spill] sm:$0xff] %v3286_v51 }
 0x419   :  { %v2206_v52 = vpop.eup %2205 }
 0x41a   :  { %v1092_v53 = vadd.f32 1.0, %v2206_v52  ;;  %v3289_v52 = vld [vmem:[#allocation2 + $0x68] sm:$0xff] }
 0x41b   :  { %v2208_v54 = vpop.eup %2207  ;;  %3752 = vst [vmem:[#allocation34_spill] sm:$0xff] %v3289_v52 }
 0x41c   :  { %2213 = vrcp.f32 %v1092_v53  ;;  %v1098_v23 = vadd.f32 1.0, %v2208_v54  ;;  %v2210_v2 = vpop.eup %2209  ;;  %v3292_v53 = vld [vmem:[#allocation2 + $0x78] sm:$0xff]  ;;  %v3295_v54 = vld [vmem:[#allocation2 + $0x60] sm:$0xff] }
 0x41d   :  { %v2212_v32 = vpop.eup %2211  ;;  %3753 = vst [vmem:[#allocation36_spill] sm:$0xff] %v3292_v53  ;;  %3754 = vst [vmem:[#allocation37_spill] sm:$0xff] %v3295_v54 }
 0x41e   :  { %2215 = vrcp.f32 %v1098_v23  ;;  %v1105_v11 = vadd.f32 1.0, %v2212_v32  ;;  %v3298_v23 = vld [vmem:[#allocation2 + $0x70] sm:$0xff]  ;;  %v3304_v32 = vld [vmem:[#allocation2 + $0x58] sm:$0xff] }
 0x41f   :  { %3755 = vst [vmem:[#allocation35_spill] sm:$0xff] %v3298_v23  ;;  %3757 = vst [vmem:[#allocation18_spill] sm:$0xff] %v3304_v32 }
 0x420   :  { %2217 = vrcp.f32 %v1105_v11  ;;  %v3316_v11 = vld [vmem:[#allocation2 + $0x38] sm:$0xff] }
 0x421   :  { %3761 = vst [vmem:[#allocation22_spill] sm:$0xff] %v3316_v11 }
 0x429   :  { %v2214_v8 = vpop.eup %2213 }
 0x42a   :  { %v1109_v9 = vmul.f32 %v2214_v8, %v2210_v2  ;;  %v3301_v2 = vld [vmem:[#allocation2 + $0x48] sm:$0xff]  ;;  %v3307_v8 = vld [vmem:[#allocation2 + $0x40] sm:$0xff] }
 0x42b   :  { %v2216_v10 = vpop.eup %2215  ;;  %3756 = vst [vmem:[#allocation17_spill] sm:$0xff] %v3301_v2  ;;  %3758 = vst [vmem:[#allocation19_spill] sm:$0xff] %v3307_v8 }
 0x42c   :  { %v1108_v12 = vmul.f32 %v2216_v10, %v3074_v5  ;;  %v3241_v5 = vld [vmem:[#allocation2 + $0xe8] sm:$0xff] }
 0x42d   :  { %v2218_v15 = vpop.eup %2217  ;;  %v3313_v10 = vld [vmem:[#allocation2 + $0x28] sm:$0xff] }
 0x42e   :  { %v3196_v13 = vadd.f32 %v1109_v9, %v1108_v12  ;;  %v3310_v9 = vld [vmem:[#allocation2 + $0x50] sm:$0xff]  ;;  %3760 = vst [vmem:[#allocation21_spill] sm:$0xff] %v3313_v10  ;;  %v3319_v12 = vld [vmem:[#allocation2 + $0x20] sm:$0xff] }
 0x42f   :  { %3759 = vst [vmem:[#allocation20_spill] sm:$0xff] %v3310_v9  ;;  %3762 = vst [vmem:[#allocation23_spill] sm:$0xff] %v3319_v12 }
 0x430   :  { %2219 = vtanh.f32 %v3196_v13 }
 0x43d   :  { %v2220_v16 = vpop.eup %2219 }
 0x43e   :  { %v1112_v17 = vmul.f32 %v2220_v16, %v2218_v15  ;;  %v3322_v15 = vld [vmem:[#allocation2 + $0x30] sm:$0xff]  ;;  %v3325_v16 = vld [vmem:[#allocation2 + $0x8] sm:$0xff] }
 0x43f   :  { %3763 = vst [vmem:[#allocation24_spill] sm:$0xff] %v3322_v15  ;;  %3764 = vst [vmem:[#allocation25_spill] sm:$0xff] %v3325_v16 }
 0x440   :  { %1178 = vmatmul.mubr.f32.vlgmr.msra.gmra.mxu0 %v1112_v17  ;;  %1249 = vmatmul.mubr.f32.vlgmr.msra.gmra.mxu1 %v1112_v17  ;;  %v3328_v17 = vld [vmem:[#allocation2 + $0x18] sm:$0xff] }
 0x441   :  { %1284 = vmatpush1.msra.mxu0 %v3077_v41  ;;  %1355 = vmatpush1.msra.mxu1 %v3080_v62  ;;  %3765 = vst [vmem:[#allocation26_spill] sm:$0xff] %v3328_v17 }
 0x442   :  { %1285 = vmatprep.subr.mxu0 %v3083_v61  ;;  %1356 = vmatprep.subr.mxu1 %v3086_v3 }
 0x443   :  { %1286 = vmatpush1.msra.mxu0 %v3089_v56  ;;  %1357 = vmatpush1.msra.mxu1 %v3092_v59 }
 0x444   :  { %1287 = vmatprep.subr.mxu0 %v3095_v60  ;;  %1358 = vmatprep.subr.mxu1 %v3098_v1 }
 0x445   :  { %1288 = vmatpush1.msra.mxu0 %v3101_v58  ;;  %1359 = vmatpush1.msra.mxu1 %v3104_v55 }
 0x446   :  { %1289 = vmatprep.subr.mxu0 %v3107_v63  ;;  %1360 = vmatprep.subr.mxu1 %v3110_v7 }
 0x447   :  { %1290 = vmatpush1.msra.mxu0 %v3113_v6  ;;  %1361 = vmatpush1.msra.mxu1 %v3116_v14 }
 0x448   :  { %1291 = vmatprep.subr.mxu0 %v3119_v4  ;;  %1362 = vmatprep.subr.mxu1 %v3122_v30 }
 0x449   :  { %1292 = vmatpush1.msra.mxu0 %v3749_v18  ;;  %1363 = vmatpush1.msra.mxu1 %v3750_v19 }
 0x44a   :  { %1293 = vmatprep.subr.mxu0 %v3131_v34  ;;  %1364 = vmatprep.subr.mxu1 %v3134_v50 }
 0x44b   :  { %1294 = vmatpush1.msra.mxu0 %v3137_v0  ;;  %1365 = vmatpush1.msra.mxu1 %v3140_v57 }
 0x44c   :  { %1295 = vmatprep.subr.mxu0 %v3143_v31  ;;  %1366 = vmatprep.subr.mxu1 %v3146_v33 }
 0x44d   :  { %1296 = vmatpush1.msra.mxu0 %v3223_v20  ;;  %1367 = vmatpush1.msra.mxu1 %v3226_v21 }
 0x44e   :  { %1297 = vmatprep.subr.mxu0 %v3229_v22  ;;  %1368 = vmatprep.subr.mxu1 %v3232_v24 }
 0x44f   :  { %1298 = vmatpush1.msra.mxu0 %v3235_v25  ;;  %1369 = vmatpush1.msra.mxu1 %v3238_v27 }
 0x450   :  { %1299 = vmatprep.subr.mxu0 %v3241_v5  ;;  %1370 = vmatprep.subr.mxu1 %v3244_v35 }
 0x451   :  { %1300 = vmatpush1.msra.mxu0 %v3247_v36  ;;  %1371 = vmatpush1.msra.mxu1 %v3250_v37 }
 0x452   :  { %1301 = vmatprep.subr.mxu0 %v3253_v38  ;;  %1372 = vmatprep.subr.mxu1 %v3256_v39 }
 0x453   :  { %1302 = vmatpush1.msra.mxu0 %v3259_v40  ;;  %1373 = vmatpush1.msra.mxu1 %v3262_v42 }
 0x454   :  { %1303 = vmatprep.subr.mxu0 %v3265_v43  ;;  %1374 = vmatprep.subr.mxu1 %v3268_v44 }
 0x455   :  { %1304 = vmatpush1.msra.mxu0 %v3271_v45  ;;  %1375 = vmatpush1.msra.mxu1 %v3274_v46 }
 0x456   :  { %1305 = vmatprep.subr.mxu0 %v3277_v47  ;;  %1376 = vmatprep.subr.mxu1 %v3280_v48 }
 0x457   :  { %1306 = vmatpush1.msra.mxu0 %v3283_v49  ;;  %1377 = vmatpush1.msra.mxu1 %v3286_v51 }
 0x458   :  { %1307 = vmatprep.subr.mxu0 %v3289_v52  ;;  %1378 = vmatprep.subr.mxu1 %v3292_v53  ;;  %v3771_v53 = vld [vmem:[#allocation47_spill] sm:$0xff] }
 0x459   :  { %1308 = vmatpush1.msra.mxu0 %v3295_v54  ;;  %1379 = vmatpush1.msra.mxu1 %v3298_v23  ;;  %v3770_v54 = vld [vmem:[#allocation49_spill] sm:$0xff] }
 0x45a   :  { %1309 = vmatprep.subr.mxu0 %v3301_v2  ;;  %1380 = vmatprep.subr.mxu1 %v3304_v32 }
 0x45b   :  { %1310 = vmatpush1.msra.mxu0 %v3307_v8  ;;  %1381 = vmatpush1.msra.mxu1 %v3310_v9  ;;  %v3769_v8 = vld [vmem:[#allocation48_spill] sm:$0xff] }
 0x45c   :  { %1311 = vmatprep.subr.mxu0 %v3313_v10  ;;  %1382 = vmatprep.subr.mxu1 %v3316_v11  ;;  %v3331_v10 = vld [vmem:[#allocation2] sm:$0xff]  ;;  %v3335_v11 = vld [vmem:[#allocation2 + $0x10] sm:$0xff] }
 0x45d   :  { %1312 = vmatpush1.msra.mxu0 %v3319_v12  ;;  %1383 = vmatpush1.msra.mxu1 %v3322_v15  ;;  %3766 = vst [vmem:[#allocation27_spill] sm:$0xff] %v3331_v10  ;;  %3767 = vst [vmem:[#allocation28_spill] sm:$0xff] %v3335_v11  ;;  %v3768_v15 = vld [vmem:[#allocation46_spill] sm:$0xff] }
 0x45e   :  { %1313 = vmatprep.subr.mxu0 %v3325_v16  ;;  %1384 = vmatprep.subr.mxu1 %v3328_v17 }
 0x45f   :  { %1314 = vmatpush1.msra.mxu0 %v3331_v10  ;;  %1347 = vmatprep.mubr.f32.mxu0 %v3735_v26 }
 0x460   :  { %1385 = vmatpush1.msra.mxu1 %v3335_v11  ;;  %1418 = vmatprep.mubr.f32.mxu1 %v3735_v26 }
 0x461   :  { %1453 = vmatprep.subr.mxu0 %v3063_v28  ;;  %1524 = vmatprep.subr.mxu1 %v3066_v29 }
 0x500   :  { %v1179_v16 = vpop.f32.mrf.mxu0  ;;  %v1250_v10 = vpop.f32.mrf.mxu1 }
 0x501   :  { %v1255_v12 = vadd.f32 %v1179_v16, %v3768_v15  ;;  %v1257_v26 = vadd.f32 %v1250_v10, %v3771_v53  ;;  %v3777_v10 = vld [vmem:[#allocation17_spill] sm:$0xff] }
 0x502   :  { %v1181_v17 = vpop.f32.mrf.mxu0  ;;  %v1252_v23 = vpop.f32.mrf.mxu1 }
 0x503   :  { %v2029_v9 = vmul.f32 -1.442695, %v1255_v12  ;;  %v1256_v32 = vadd.f32 %v1181_v17, %v3769_v8  ;;  %v1258_v11 = vadd.f32 %v1252_v23, %v3770_v54  ;;  %v3776_v23 = vld [vmem:[#allocation35_spill] sm:$0xff] }
 0x505   :  { %2221 = vpow2.f32 %v2029_v9  ;;  %v2030_v2 = vmul.f32 -1.442695, %v1256_v32  ;;  %v2031_v52 = vmul.f32 -1.442695, %v1258_v11  ;;  %v3778_v11 = vld [vmem:[#allocation18_spill] sm:$0xff] }
 0x507   :  { %2223 = vpow2.f32 %v2030_v2 }
 0x508   :  { %2225 = vtanh.f32 %v1257_v26 }
 0x509   :  { %2227 = vpow2.f32 %v2031_v52  ;;  %v3775_v52 = vld [vmem:[#allocation37_spill] sm:$0xff] }
 0x512   :  { %v2222_v28 = vpop.eup %2221 }
 0x513   :  { %v1262_v51 = vadd.f32 1.0, %v2222_v28 }
 0x514   :  { %v2224_v29 = vpop.eup %2223 }
 0x515   :  { %2229 = vrcp.f32 %v1262_v51  ;;  %v1268_v15 = vadd.f32 1.0, %v2224_v29  ;;  %v2226_v12 = vpop.eup %2225  ;;  %v3772_v29 = vld [vmem:[#allocation13_spill] sm:$0xff]  ;;  %v3774_v51 = vld [vmem:[#allocation36_spill] sm:$0xff] }
 0x516   :  { %v2228_v8 = vpop.eup %2227 }
 0x517   :  { %2231 = vrcp.f32 %v1268_v15  ;;  %v1275_v2 = vadd.f32 1.0, %v2228_v8  ;;  %v3779_v15 = vld [vmem:[#allocation19_spill] sm:$0xff]  ;;  %v3781_v8 = vld [vmem:[#allocation21_spill] sm:$0xff] }
 0x519   :  { %2233 = vrcp.f32 %v1275_v2  ;;  %v3785_v2 = vld [vmem:[#allocation25_spill] sm:$0xff] }
 0x522   :  { %v2230_v9 = vpop.eup %2229 }
 0x523   :  { %v1279_v16 = vmul.f32 %v2230_v9, %v2226_v12  ;;  %v3780_v12 = vld [vmem:[#allocation20_spill] sm:$0xff]  ;;  %v3782_v9 = vld [vmem:[#allocation22_spill] sm:$0xff] }
 0x524   :  { %v2232_v32 = vpop.eup %2231 }
 0x525   :  { %v1278_v17 = vmul.f32 %v2232_v32, %v3196_v13  ;;  %v3773_v13 = vld [vmem:[#allocation34_spill] sm:$0xff]  ;;  %v3784_v32 = vld [vmem:[#allocation24_spill] sm:$0xff] }
 0x526   :  { %v2234_v28 = vpop.eup %2233 }
 0x527   :  { %v3346_v54 = vadd.f32 %v1279_v16, %v1278_v17  ;;  %v3783_v16 = vld [vmem:[#allocation23_spill] sm:$0xff]  ;;  %v3786_v17 = vld [vmem:[#allocation26_spill] sm:$0xff] }
 0x529   :  { %2235 = vtanh.f32 %v3346_v54 }
 0x536   :  { %v2236_v26 = vpop.eup %2235 }
 0x537   :  { %v1282_v53 = vmul.f32 %v2236_v26, %v2234_v28  ;;  %v3787_v28 = vld [vmem:[#allocation27_spill] sm:$0xff]  ;;  %v3788_v26 = vmov 0.0  }
 0x539   :  { %1348 = vmatmul.mubr.f32.vlgmr.msra.gmra.mxu0 %v1282_v53  ;;  %1419 = vmatmul.mubr.f32.vlgmr.msra.gmra.mxu1 %v1282_v53  ;;  %v3789_v53 = vld [vmem:[#allocation28_spill] sm:$0xff] }
 0x53a   :  { %1454 = vmatpush1.msra.mxu0 %v3077_v41  ;;  %1525 = vmatpush1.msra.mxu1 %v3080_v62 }
 0x53b   :  { %1455 = vmatprep.subr.mxu0 %v3083_v61  ;;  %1526 = vmatprep.subr.mxu1 %v3086_v3 }
 0x53c   :  { %1456 = vmatpush1.msra.mxu0 %v3089_v56  ;;  %1527 = vmatpush1.msra.mxu1 %v3092_v59 }
 0x53d   :  { %1457 = vmatprep.subr.mxu0 %v3095_v60  ;;  %1528 = vmatprep.subr.mxu1 %v3098_v1 }
 0x53e   :  { %1458 = vmatpush1.msra.mxu0 %v3101_v58  ;;  %1529 = vmatpush1.msra.mxu1 %v3104_v55 }
 0x53f   :  { %1459 = vmatprep.subr.mxu0 %v3107_v63  ;;  %1530 = vmatprep.subr.mxu1 %v3110_v7 }
 0x540   :  { %1460 = vmatpush1.msra.mxu0 %v3113_v6  ;;  %1531 = vmatpush1.msra.mxu1 %v3116_v14 }
 0x541   :  { %1461 = vmatprep.subr.mxu0 %v3119_v4  ;;  %1532 = vmatprep.subr.mxu1 %v3122_v30 }
 0x542   :  { %1462 = vmatpush1.msra.mxu0 %v3749_v18  ;;  %1533 = vmatpush1.msra.mxu1 %v3750_v19 }
 0x543   :  { %1463 = vmatprep.subr.mxu0 %v3131_v34  ;;  %1534 = vmatprep.subr.mxu1 %v3134_v50 }
 0x544   :  { %1464 = vmatpush1.msra.mxu0 %v3137_v0  ;;  %1535 = vmatpush1.msra.mxu1 %v3140_v57 }
 0x545   :  { %1465 = vmatprep.subr.mxu0 %v3143_v31  ;;  %1536 = vmatprep.subr.mxu1 %v3146_v33 }
 0x546   :  { %1466 = vmatpush1.msra.mxu0 %v3223_v20  ;;  %1537 = vmatpush1.msra.mxu1 %v3226_v21 }
 0x547   :  { %1467 = vmatprep.subr.mxu0 %v3229_v22  ;;  %1538 = vmatprep.subr.mxu1 %v3232_v24 }
 0x548   :  { %1468 = vmatpush1.msra.mxu0 %v3235_v25  ;;  %1539 = vmatpush1.msra.mxu1 %v3238_v27 }
 0x549   :  { %1469 = vmatprep.subr.mxu0 %v3241_v5  ;;  %1540 = vmatprep.subr.mxu1 %v3244_v35 }
 0x54a   :  { %1470 = vmatpush1.msra.mxu0 %v3247_v36  ;;  %1541 = vmatpush1.msra.mxu1 %v3250_v37 }
 0x54b   :  { %1471 = vmatprep.subr.mxu0 %v3253_v38  ;;  %1542 = vmatprep.subr.mxu1 %v3256_v39 }
 0x54c   :  { %1472 = vmatpush1.msra.mxu0 %v3259_v40  ;;  %1543 = vmatpush1.msra.mxu1 %v3262_v42 }
 0x54d   :  { %1473 = vmatprep.subr.mxu0 %v3265_v43  ;;  %1544 = vmatprep.subr.mxu1 %v3268_v44 }
 0x54e   :  { %1474 = vmatpush1.msra.mxu0 %v3271_v45  ;;  %1545 = vmatpush1.msra.mxu1 %v3274_v46 }
 0x54f   :  { %1475 = vmatprep.subr.mxu0 %v3277_v47  ;;  %1546 = vmatprep.subr.mxu1 %v3280_v48 }
 0x550   :  { %1476 = vmatpush1.msra.mxu0 %v3283_v49  ;;  %1547 = vmatpush1.msra.mxu1 %v3772_v29 }
 0x551   :  { %1477 = vmatprep.subr.mxu0 %v3773_v13  ;;  %1548 = vmatprep.subr.mxu1 %v3774_v51  ;;  %v3795_v51 = vld [vmem:[#allocation51_spill] sm:$0xff] }
 0x552   :  { %1478 = vmatpush1.msra.mxu0 %v3775_v52  ;;  %1549 = vmatpush1.msra.mxu1 %v3776_v23  ;;  %v3794_v52 = vld [vmem:[#allocation53_spill] sm:$0xff] }
 0x553   :  { %1479 = vmatprep.subr.mxu0 %v3777_v10  ;;  %1550 = vmatprep.subr.mxu1 %v3778_v11 }
 0x554   :  { %1480 = vmatpush1.msra.mxu0 %v3779_v15  ;;  %1551 = vmatpush1.msra.mxu1 %v3780_v12  ;;  %v3790_v12 = vld [vmem:[#allocation14_spill] sm:$0xff] }
 0x555   :  { %1481 = vmatprep.subr.mxu0 %v3781_v8  ;;  %1552 = vmatprep.subr.mxu1 %v3782_v9  ;;  %v3791_v8 = vld [vmem:[#allocation15_spill] sm:$0xff] }
 0x556   :  { %1482 = vmatpush1.msra.mxu0 %v3783_v16  ;;  %1553 = vmatpush1.msra.mxu1 %v3784_v32  ;;  %v3792_v16 = vld [vmem:[#allocation50_spill] sm:$0xff] }
 0x557   :  { %1483 = vmatprep.subr.mxu0 %v3785_v2  ;;  %1554 = vmatprep.subr.mxu1 %v3786_v17  ;;  %v3793_v2 = vld [vmem:[#allocation52_spill] sm:$0xff] }
 0x558   :  { %1484 = vmatpush1.msra.mxu0 %v3787_v28  ;;  %1517 = vmatprep.mubr.f32.mxu0 %v3788_v26 }
 0x559   :  { %1555 = vmatpush1.msra.mxu1 %v3789_v53  ;;  %1588 = vmatprep.mubr.f32.mxu1 %v3788_v26 }
 0x55a   :  { %1623 = vmatprep.subr.mxu0 %v3790_v12  ;;  %1694 = vmatprep.subr.mxu1 %v3791_v8 }
 0x5f9   :  { %v1349_v9 = vpop.f32.mrf.mxu0  ;;  %v1420_v17 = vpop.f32.mrf.mxu1 }
 0x5fa   :  { %v1425_v15 = vadd.f32 %v1349_v9, %v3792_v16  ;;  %v1427_v26 = vadd.f32 %v1420_v17, %v3795_v51 }
 0x5fb   :  { %v1351_v32 = vpop.f32.mrf.mxu0  ;;  %v1422_v23 = vpop.f32.mrf.mxu1 }
 0x5fc   :  { %v2032_v11 = vmul.f32 -1.442695, %v1425_v15  ;;  %v1426_v10 = vadd.f32 %v1351_v32, %v3793_v2  ;;  %v1428_v53 = vadd.f32 %v1422_v23, %v3794_v52 }
 0x5fe   :  { %2237 = vpow2.f32 %v2032_v11  ;;  %v2033_v28 = vmul.f32 -1.442695, %v1426_v10  ;;  %v2034_v13 = vmul.f32 -1.442695, %v1428_v53  ;;  %v1807_v53 = vld [vmem:[#allocation5 + $0x70] sm:$0xff] }
 0x600   :  { %2239 = vpow2.f32 %v2033_v28 }
 0x601   :  { %2241 = vtanh.f32 %v1427_v26  ;;  %v1808_v26 = vld [vmem:[#allocation5 + $0x78] sm:$0xff] }
 0x602   :  { %2243 = vpow2.f32 %v2034_v13 }
 0x60b   :  { %v2238_v12 = vpop.eup %2237 }
 0x60c   :  { %v1432_v29 = vadd.f32 1.0, %v2238_v12  ;;  %v1806_v12 = vld [vmem:[#allocation5 + $0x68] sm:$0xff] }
 0x60d   :  { %v2240_v8 = vpop.eup %2239 }
 0x60e   :  { %2245 = vrcp.f32 %v1432_v29  ;;  %v1438_v9 = vadd.f32 1.0, %v2240_v8  ;;  %v2242_v15 = vpop.eup %2241  ;;  %v1805_v8 = vld [vmem:[#allocation5 + $0x60] sm:$0xff] }
 0x60f   :  { %v2244_v16 = vpop.eup %2243 }
 0x610   :  { %2247 = vrcp.f32 %v1438_v9  ;;  %v1445_v2 = vadd.f32 1.0, %v2244_v16  ;;  %v1804_v9 = vld [vmem:[#allocation5 + $0x58] sm:$0xff]  ;;  %v1802_v16 = vld [vmem:[#allocation5 + $0x48] sm:$0xff] }
 0x612   :  { %2249 = vrcp.f32 %v1445_v2  ;;  %v1798_v2 = vld [vmem:[#allocation5 + $0x28] sm:$0xff] }
 0x61b   :  { %v2246_v11 = vpop.eup %2245 }
 0x61c   :  { %v1449_v32 = vmul.f32 %v2246_v11, %v2242_v15  ;;  %v1803_v15 = vld [vmem:[#allocation5 + $0x50] sm:$0xff]  ;;  %v1801_v11 = vld [vmem:[#allocation5 + $0x40] sm:$0xff] }
 0x61d   :  { %v2248_v10 = vpop.eup %2247 }
 0x61e   :  { %v1448_v28 = vmul.f32 %v2248_v10, %v3346_v54  ;;  %v1799_v10 = vld [vmem:[#allocation5 + $0x30] sm:$0xff] }
 0x61f   :  { %v2250_v51 = vpop.eup %2249 }
 0x620   :  { %v3420_v52 = vadd.f32 %v1449_v32, %v1448_v28  ;;  %v1800_v32 = vld [vmem:[#allocation5 + $0x38] sm:$0xff]  ;;  %v1797_v28 = vld [vmem:[#allocation5 + $0x20] sm:$0xff] }
 0x622   :  { %2251 = vtanh.f32 %v3420_v52 }
 0x62f   :  { %v2252_v23 = vpop.eup %2251 }
 0x630   :  { %v1452_v17 = vmul.f32 %v2252_v23, %v2250_v51  ;;  %v1795_v51 = vld [vmem:[#allocation5 + $0x10] sm:$0xff]  ;;  %v1794_v23 = vld [vmem:[#allocation5 + $0x8] sm:$0xff] }
 0x632   :  { %1518 = vmatmul.mubr.f32.vlgmr.msra.gmra.mxu0 %v1452_v17  ;;  %1589 = vmatmul.mubr.f32.vlgmr.msra.gmra.mxu1 %v1452_v17  ;;  %v1793_v17 = vld [vmem:[#allocation5] sm:$0xff] }
 0x633   :  { %1624 = vmatpush1.msra.mxu0 %v3077_v41  ;;  %1695 = vmatpush1.msra.mxu1 %v3080_v62  ;;  %v3796_v41 = vld [vmem:[#allocation13_spill] sm:$0xff]  ;;  %v3797_v62 = vld [vmem:[#allocation34_spill] sm:$0xff] }
 0x634   :  { %1625 = vmatprep.subr.mxu0 %v3083_v61  ;;  %1696 = vmatprep.subr.mxu1 %v3086_v3  ;;  %v3798_v61 = vld [vmem:[#allocation36_spill] sm:$0xff]  ;;  %v3799_v3 = vld [vmem:[#allocation37_spill] sm:$0xff] }
 0x635   :  { %1626 = vmatpush1.msra.mxu0 %v3089_v56  ;;  %1697 = vmatpush1.msra.mxu1 %v3092_v59  ;;  %v3800_v56 = vld [vmem:[#allocation35_spill] sm:$0xff]  ;;  %v3801_v59 = vld [vmem:[#allocation17_spill] sm:$0xff] }
 0x636   :  { %1627 = vmatprep.subr.mxu0 %v3095_v60  ;;  %1698 = vmatprep.subr.mxu1 %v3098_v1  ;;  %v3802_v60 = vld [vmem:[#allocation18_spill] sm:$0xff]  ;;  %v3803_v1 = vld [vmem:[#allocation19_spill] sm:$0xff] }
 0x637   :  { %1628 = vmatpush1.msra.mxu0 %v3101_v58  ;;  %1699 = vmatpush1.msra.mxu1 %v3104_v55  ;;  %v3804_v58 = vld [vmem:[#allocation20_spill] sm:$0xff]  ;;  %v3805_v55 = vld [vmem:[#allocation21_spill] sm:$0xff] }
 0x638   :  { %1629 = vmatprep.subr.mxu0 %v3107_v63  ;;  %1700 = vmatprep.subr.mxu1 %v3110_v7  ;;  %v3806_v63 = vld [vmem:[#allocation22_spill] sm:$0xff]  ;;  %v3807_v7 = vld [vmem:[#allocation23_spill] sm:$0xff] }
 0x639   :  { %1630 = vmatpush1.msra.mxu0 %v3113_v6  ;;  %1701 = vmatpush1.msra.mxu1 %v3116_v14  ;;  %v3808_v6 = vld [vmem:[#allocation24_spill] sm:$0xff]  ;;  %v3809_v14 = vld [vmem:[#allocation25_spill] sm:$0xff] }
 0x63a   :  { %1631 = vmatprep.subr.mxu0 %v3119_v4  ;;  %1702 = vmatprep.subr.mxu1 %v3122_v30  ;;  %v3810_v4 = vld [vmem:[#allocation26_spill] sm:$0xff]  ;;  %v3811_v30 = vld [vmem:[#allocation27_spill] sm:$0xff] }
 0x63b   :  { %1632 = vmatpush1.msra.mxu0 %v3749_v18  ;;  %1703 = vmatpush1.msra.mxu1 %v3750_v19  ;;  %v3815_v19 = vld [vmem:[#allocation56_spill] sm:$0xff] }
 0x63c   :  { %1633 = vmatprep.subr.mxu0 %v3131_v34  ;;  %1704 = vmatprep.subr.mxu1 %v3134_v50  ;;  %v3814_v50 = vld [vmem:[#allocation54_spill] sm:$0xff] }
 0x63d   :  { %1634 = vmatpush1.msra.mxu0 %v3137_v0  ;;  %1705 = vmatpush1.msra.mxu1 %v3140_v57 }
 0x63e   :  { %1635 = vmatprep.subr.mxu0 %v3143_v31  ;;  %1706 = vmatprep.subr.mxu1 %v3146_v33  ;;  %v3812_v31 = vmov 0.0   ;;  %v3813_v33 = vld [vmem:[#allocation28_spill] sm:$0xff] }
 0x63f   :  { %1636 = vmatpush1.msra.mxu0 %v3223_v20  ;;  %1707 = vmatpush1.msra.mxu1 %v3226_v21 }
 0x640   :  { %1637 = vmatprep.subr.mxu0 %v3229_v22  ;;  %1708 = vmatprep.subr.mxu1 %v3232_v24 }
 0x641   :  { %1638 = vmatpush1.msra.mxu0 %v3235_v25  ;;  %1709 = vmatpush1.msra.mxu1 %v3238_v27  ;;  %v3816_v25 = vld [vmem:[#allocation57_spill] sm:$0xff] }
 0x642   :  { %1639 = vmatprep.subr.mxu0 %v3241_v5  ;;  %1710 = vmatprep.subr.mxu1 %v3244_v35  ;;  %v3817_v5 = vld [vmem:[#allocation55_spill] sm:$0xff] }
 0x643   :  { %1640 = vmatpush1.msra.mxu0 %v3247_v36  ;;  %1711 = vmatpush1.msra.mxu1 %v3250_v37 }
 0x644   :  { %1641 = vmatprep.subr.mxu0 %v3253_v38  ;;  %1712 = vmatprep.subr.mxu1 %v3256_v39 }
 0x645   :  { %1642 = vmatpush1.msra.mxu0 %v3259_v40  ;;  %1713 = vmatpush1.msra.mxu1 %v3262_v42 }
 0x646   :  { %1643 = vmatprep.subr.mxu0 %v3265_v43  ;;  %1714 = vmatprep.subr.mxu1 %v3268_v44 }
 0x647   :  { %1644 = vmatpush1.msra.mxu0 %v3271_v45  ;;  %1715 = vmatpush1.msra.mxu1 %v3274_v46 }
 0x648   :  { %1645 = vmatprep.subr.mxu0 %v3277_v47  ;;  %1716 = vmatprep.subr.mxu1 %v3280_v48 }
 0x649   :  { %1646 = vmatpush1.msra.mxu0 %v3283_v49  ;;  %1717 = vmatpush1.msra.mxu1 %v3796_v41  ;;  %v1902_v41 = vld [vmem:[#allocation7 + $0x78] sm:$0xff] }
 0x64a   :  { %1647 = vmatprep.subr.mxu0 %v3797_v62  ;;  %1718 = vmatprep.subr.mxu1 %v3798_v61  ;;  %v1901_v62 = vld [vmem:[#allocation7 + $0x70] sm:$0xff]  ;;  %v1900_v61 = vld [vmem:[#allocation7 + $0x68] sm:$0xff] }
 0x64b   :  { %1648 = vmatpush1.msra.mxu0 %v3799_v3  ;;  %1719 = vmatpush1.msra.mxu1 %v3800_v56  ;;  %v1899_v3 = vld [vmem:[#allocation7 + $0x60] sm:$0xff]  ;;  %v1898_v56 = vld [vmem:[#allocation7 + $0x58] sm:$0xff] }
 0x64c   :  { %1649 = vmatprep.subr.mxu0 %v3801_v59  ;;  %1720 = vmatprep.subr.mxu1 %v3802_v60  ;;  %v1897_v59 = vld [vmem:[#allocation7 + $0x50] sm:$0xff]  ;;  %v1896_v60 = vld [vmem:[#allocation7 + $0x48] sm:$0xff] }
 0x64d   :  { %1650 = vmatpush1.msra.mxu0 %v3803_v1  ;;  %1721 = vmatpush1.msra.mxu1 %v3804_v58  ;;  %v1895_v1 = vld [vmem:[#allocation7 + $0x40] sm:$0xff]  ;;  %v1894_v58 = vld [vmem:[#allocation7 + $0x38] sm:$0xff] }
 0x64e   :  { %1651 = vmatprep.subr.mxu0 %v3805_v55  ;;  %1722 = vmatprep.subr.mxu1 %v3806_v63  ;;  %v1893_v55 = vld [vmem:[#allocation7 + $0x30] sm:$0xff]  ;;  %v1892_v63 = vld [vmem:[#allocation7 + $0x28] sm:$0xff] }
 0x64f   :  { %1652 = vmatpush1.msra.mxu0 %v3807_v7  ;;  %1723 = vmatpush1.msra.mxu1 %v3808_v6  ;;  %v1891_v7 = vld [vmem:[#allocation7 + $0x20] sm:$0xff]  ;;  %v1890_v6 = vld [vmem:[#allocation7 + $0x18] sm:$0xff] }
 0x650   :  { %1653 = vmatprep.subr.mxu0 %v3809_v14  ;;  %1724 = vmatprep.subr.mxu1 %v3810_v4  ;;  %v3818_v4 = vld [vmem:[#allocation58_spill] sm:$0xff] }
 0x651   :  { %1654 = vmatpush1.msra.mxu0 %v3811_v30  ;;  %1687 = vmatprep.mubr.f32.mxu0 %v3812_v31 }
 0x652   :  { %1725 = vmatpush1.msra.mxu1 %v3813_v33  ;;  %1758 = vmatprep.mubr.f32.mxu1 %v3812_v31 }
 0x653   :  { %2077 = vmatprep.subr.mxu0 %v3812_v31  ;;  %2112 = vmatprep.subr.mxu1 %v3812_v31 }
 0x6f2   :  { %v1519_v34 = vpop.f32.mrf.mxu0  ;;  %v1590_v21 = vpop.f32.mrf.mxu1 }
 0x6f3   :  { %v1595_v0 = vadd.f32 %v1519_v34, %v3814_v50  ;;  %v1597_v35 = vadd.f32 %v1590_v21, %v3817_v5  ;;  %v3819_v50 = vld [vmem:[#allocation60_spill] sm:$0xff] }
 0x6f4   :  { %v1521_v57 = vpop.f32.mrf.mxu0  ;;  %v1592_v24 = vpop.f32.mrf.mxu1 }
 0x6f5   :  { %v2035_v18 = vmul.f32 -1.442695, %v1595_v0  ;;  %v1596_v20 = vadd.f32 %v1521_v57, %v3815_v19  ;;  %v1598_v27 = vadd.f32 %v1592_v24, %v3816_v25 }
 0x6f7   :  { %2253 = vpow2.f32 %v2035_v18  ;;  %v2036_v22 = vmul.f32 -1.442695, %v1596_v20  ;;  %v2037_v36 = vmul.f32 -1.442695, %v1598_v27  ;;  %v3820_v20 = vld [vmem:[#allocation61_spill] sm:$0xff] }
 0x6f9   :  { %2255 = vpow2.f32 %v2036_v22  ;;  %v3821_v22 = vld [vmem:[#allocation59_spill] sm:$0xff] }
 0x6fa   :  { %2257 = vtanh.f32 %v1597_v35 }
 0x6fb   :  { %2259 = vpow2.f32 %v2037_v36 }
 0x704   :  { %v2254_v37 = vpop.eup %2253 }
 0x705   :  { %v1602_v38 = vadd.f32 1.0, %v2254_v37 }
 0x706   :  { %v2256_v39 = vpop.eup %2255 }
 0x707   :  { %2261 = vrcp.f32 %v1602_v38  ;;  %v1608_v40 = vadd.f32 1.0, %v2256_v39  ;;  %v2258_v42 = vpop.eup %2257 }
 0x708   :  { %v2260_v43 = vpop.eup %2259 }
 0x709   :  { %2263 = vrcp.f32 %v1608_v40  ;;  %v1615_v47 = vadd.f32 1.0, %v2260_v43 }
 0x70b   :  { %2265 = vrcp.f32 %v1615_v47 }
 0x714   :  { %v2262_v44 = vpop.eup %2261 }
 0x715   :  { %v1619_v45 = vmul.f32 %v2262_v44, %v2258_v42 }
 0x716   :  { %v2264_v46 = vpop.eup %2263 }
 0x717   :  { %v1618_v48 = vmul.f32 %v2264_v46, %v3420_v52  ;;  %v1796_v52 = vld [vmem:[#allocation5 + $0x18] sm:$0xff] }
 0x718   :  { %v2266_v54 = vpop.eup %2265 }
 0x719   :  { %v3494_v49 = vadd.f32 %v1619_v45, %v1618_v48 }
 0x71b   :  { %2267 = vtanh.f32 %v3494_v49 }
 0x728   :  { %v2268_v29 = vpop.eup %2267 }
 0x729   :  { %v1622_v13 = vmul.f32 %v2268_v29, %v2266_v54  ;;  %v1889_v54 = vld [vmem:[#allocation7 + $0x10] sm:$0xff]  ;;  %v1888_v29 = vld [vmem:[#allocation7 + $0x8] sm:$0xff] }
 0x72b   :  { %1688 = vmatmul.mubr.f32.vlgmr.msra.gmra.mxu0 %v1622_v13  ;;  %1759 = vmatmul.mubr.f32.vlgmr.msra.gmra.mxu1 %v1622_v13  ;;  %v1887_v13 = vld [vmem:[#allocation7] sm:$0xff] }
 0x72c   :  { %2078 = vmatpush3.msra.mxu0 %v1808_v26  ;;  %2109 = vmatprep.mubr.msk.f32.mxu0 %vm2443_vm2, %v3812_v31 }
 0x72d   :  { %2079 = vmatprep.subr.mxu0 %v3812_v31  ;;  %2144 = vmatprep.mubr.msk.f32.mxu1 %vm2443_vm2, %v3812_v31 }
 0x72e   :  { %2080 = vmatpush3.msra.mxu0 %v1807_v53  ;;  %2113 = vmatpush3.msra.mxu1 %v1902_v41 }
 0x72f   :  { %2081 = vmatprep.subr.mxu0 %v3812_v31  ;;  %2114 = vmatprep.subr.mxu1 %v3812_v31 }
 0x730   :  { %2082 = vmatpush3.msra.mxu0 %v1806_v12  ;;  %2115 = vmatpush3.msra.mxu1 %v1901_v62 }
 0x731   :  { %2083 = vmatprep.subr.mxu0 %v3812_v31  ;;  %2116 = vmatprep.subr.mxu1 %v3812_v31 }
 0x732   :  { %2084 = vmatpush3.msra.mxu0 %v1805_v8  ;;  %2117 = vmatpush3.msra.mxu1 %v1900_v61 }
 0x733   :  { %2085 = vmatprep.subr.mxu0 %v3812_v31  ;;  %2118 = vmatprep.subr.mxu1 %v3812_v31 }
 0x734   :  { %2086 = vmatpush3.msra.mxu0 %v1804_v9  ;;  %2119 = vmatpush3.msra.mxu1 %v1899_v3  ;;  %v2042_v9 = vld [vmem:[%s3550_s7] ss:$0 sm:$0xff] }
 0x735   :  { %2087 = vmatprep.subr.mxu0 %v3812_v31  ;;  %2120 = vmatprep.subr.mxu1 %v3812_v31 }
 0x736   :  { %2088 = vmatpush3.msra.mxu0 %v1803_v15  ;;  %2121 = vmatpush3.msra.mxu1 %v1898_v56 }
 0x737   :  { %2089 = vmatprep.subr.mxu0 %v3812_v31  ;;  %2122 = vmatprep.subr.mxu1 %v3812_v31 }
 0x738   :  { %2090 = vmatpush3.msra.mxu0 %v1802_v16  ;;  %2123 = vmatpush3.msra.mxu1 %v1897_v59 }
 0x739   :  { %2091 = vmatprep.subr.mxu0 %v3812_v31  ;;  %2124 = vmatprep.subr.mxu1 %v3812_v31 }
 0x73a   :  { %2092 = vmatpush3.msra.mxu0 %v1801_v11  ;;  %2125 = vmatpush3.msra.mxu1 %v1896_v60 }
 0x73b   :  { %2093 = vmatprep.subr.mxu0 %v3812_v31  ;;  %2126 = vmatprep.subr.mxu1 %v3812_v31 }
 0x73c   :  { %2094 = vmatpush3.msra.mxu0 %v1800_v32  ;;  %2127 = vmatpush3.msra.mxu1 %v1895_v1 }
 0x73d   :  { %2095 = vmatprep.subr.mxu0 %v3812_v31  ;;  %2128 = vmatprep.subr.mxu1 %v3812_v31 }
 0x73e   :  { %2096 = vmatpush3.msra.mxu0 %v1799_v10  ;;  %2129 = vmatpush3.msra.mxu1 %v1894_v58 }
 0x73f   :  { %2097 = vmatprep.subr.mxu0 %v3812_v31  ;;  %2130 = vmatprep.subr.mxu1 %v3812_v31 }
 0x740   :  { %2098 = vmatpush3.msra.mxu0 %v1798_v2  ;;  %2131 = vmatpush3.msra.mxu1 %v1893_v55 }
 0x741   :  { %2099 = vmatprep.subr.mxu0 %v3812_v31  ;;  %2132 = vmatprep.subr.mxu1 %v3812_v31 }
 0x742   :  { %2100 = vmatpush3.msra.mxu0 %v1797_v28  ;;  %2133 = vmatpush3.msra.mxu1 %v1892_v63 }
 0x743   :  { %2101 = vmatprep.subr.mxu0 %v3812_v31  ;;  %2134 = vmatprep.subr.mxu1 %v3812_v31 }
 0x744   :  { %2102 = vmatpush3.msra.mxu0 %v1796_v52  ;;  %2135 = vmatpush3.msra.mxu1 %v1891_v7 }
 0x745   :  { %2103 = vmatprep.subr.mxu0 %v3812_v31  ;;  %2136 = vmatprep.subr.mxu1 %v3812_v31 }
 0x746   :  { %2104 = vmatpush3.msra.mxu0 %v1795_v51  ;;  %2137 = vmatpush3.msra.mxu1 %v1890_v6 }
 0x747   :  { %2105 = vmatprep.subr.mxu0 %v3812_v31  ;;  %2138 = vmatprep.subr.mxu1 %v3812_v31 }
 0x748   :  { %2106 = vmatpush3.msra.mxu0 %v1794_v23  ;;  %2139 = vmatpush3.msra.mxu1 %v1889_v54 }
 0x749   :  { %2107 = vmatprep.subr.mxu0 %v3812_v31  ;;  %2140 = vmatprep.subr.mxu1 %v3812_v31 }
 0x74a   :  { %2108 = vmatpush3.msra.mxu0 %v1793_v17  ;;  %2141 = vmatpush3.msra.mxu1 %v1888_v29 }
 0x74b   :  { %2142 = vmatprep.subr.mxu1 %v3812_v31 }
 0x74c   :  { %2143 = vmatpush3.msra.mxu1 %v1887_v13 }
 0x7eb   :  { %v1689_v14 = vpop.f32.mrf.mxu0  ;;  %v1760_v57 = vpop.f32.mrf.mxu1 }
 0x7ec   :  { %v1765_v30 = vadd.f32 %v1689_v14, %v3818_v4  ;;  %v1767_v24 = vadd.f32 %v1760_v57, %v3821_v22 }
 0x7ed   :  { %v1691_v33 = vpop.f32.mrf.mxu0  ;;  %v1762_v19 = vpop.f32.mrf.mxu1 }
 0x7ee   :  { %v2038_v34 = vmul.f32 -1.442695, %v1765_v30  ;;  %v1766_v0 = vadd.f32 %v1691_v33, %v3819_v50  ;;  %v1768_v21 = vadd.f32 %v1762_v19, %v3820_v20 }
 0x7f0   :  { %2269 = vpow2.f32 %v2038_v34  ;;  %v2039_v18 = vmul.f32 -1.442695, %v1766_v0  ;;  %v2040_v25 = vmul.f32 -1.442695, %v1768_v21 }
 0x7f2   :  { %2271 = vpow2.f32 %v2039_v18 }
 0x7f3   :  { %2273 = vtanh.f32 %v1767_v24 }
 0x7f4   :  { %2275 = vpow2.f32 %v2040_v25 }
 0x7fd   :  { %v2270_v27 = vpop.eup %2269 }
 0x7fe   :  { %v1772_v5 = vadd.f32 1.0, %v2270_v27 }
 0x7ff   :  { %v2272_v35 = vpop.eup %2271 }
 0x800   :  { %2277 = vrcp.f32 %v1772_v5  ;;  %v1778_v36 = vadd.f32 1.0, %v2272_v35  ;;  %v2274_v37 = vpop.eup %2273 }
 0x801   :  { %v2276_v38 = vpop.eup %2275 }
 0x802   :  { %2279 = vrcp.f32 %v1778_v36  ;;  %v1785_v43 = vadd.f32 1.0, %v2276_v38 }
 0x804   :  { %2281 = vrcp.f32 %v1785_v43 }
 0x80d   :  { %v2278_v39 = vpop.eup %2277 }
 0x80e   :  { %v1789_v40 = vmul.f32 %v2278_v39, %v2274_v37 }
 0x80f   :  { %v2280_v42 = vpop.eup %2279 }
 0x810   :  { %v1788_v44 = vmul.f32 %v2280_v42, %v3494_v49  ;;  %v2041_v49 = vld [vmem:[%s3548_s5] ss:$0 sm:$0xff] }
 0x811   :  { %v2282_v46 = vpop.eup %2281 }
 0x812   :  { %v1790_v45 = vadd.f32 %v1789_v40, %v1788_v44 }
 0x814   :  { %2283 = vtanh.f32 %v1790_v45 }
 0x821   :  { %v2284_v47 = vpop.eup %2283 }
 0x822   :  { %v1792_v48 = vmul.f32 %v2284_v47, %v2282_v46 }
 0x824   :  { %2110 = vmatmul.mubr.f32.vlgmr.msra.gmra.mxu0 %v1792_v48 }
 0x8e4   :  { %v1882_v26 = vpop.f32.mrf.mxu0 }
 0x8e5   :  { %v1883_v53 = vadd.f32 %v2041_v49, %v1882_v26 }
 0x8e6   :  { %v2111_v12 = vpop.f32.mrf.mxu0 }
 0x8e7   :  { %v1886_v8 = vmax.f32 %v1883_v53, 0.0 }
 0x8e9   :  { %2145 = vmatmul.mubr.f32.vlgmr.msra.gmra.mxu1 %v1886_v8 }
 0x9a9   :  { %v1976_v15 = vpop.f32.mrf.mxu1 }
 0x9aa   :  { %v1977_v16 = vadd.f32 %v2042_v9, %v1976_v15 }
 0x9ab   :  { %v2146_v31 = vpop.f32.mrf.mxu1 }
 0x9ac   :  { %1980 = vst [vmem:[#allocation8] sm:$0xff] %v1977_v16 }
 0x9ad   :  { %2420 = shalt.err (!%p2417_p5)
}
 0x9ae   :  { %1990 = dma.vmem_to_hbm [thread:$0]  %s1988_s25, 128, %s3551_s8, [#allocation4]  }
 0x9af   :  { %2433 = dma.done.wait [#allocation4], 128  }
 0x9b0   :  { %2434 = vsyncadd [#allocation4], 4294967168 }
 0x9b1   :  { %1994 = vsyncpa [#allocation3], 1 }
 0x9b2   :  { %1995 = vsyncpa [#allocation6], 1 }
 0x9b3   :  { %1996 = vsyncpa [#allocation4], 1 }

</bundles_post_ra>
